<compile_context>
chip_gen: v6e
topology: v6e:2x2x1
jax: 0.10.0
libtpu: 0.0.40
codegen_flags: <defaults>
</compile_context>

<pallas_src>
import functools

import jax
import jax.numpy as jnp
import numpy as np
from jax import lax
from jax.experimental import pallas as pl
from jax.experimental.pallas import tpu as pltpu

_NEG_PAD = -1e30           # bias value for padded entity columns (drops out of LSE)
TILE_N_DEFAULT = 4096      # entity tile width; sweep per chip (v7x ~2k-8k, v6e 16k-32k)


def _round_up(x, m):
    return ((x + m - 1) // m) * m


def _entity_tiling(n_entity, tile_n):
    """Effective (TN, Npad): TN a multiple of 128, Npad a multiple of TN."""
    tn = max(128, _round_up(int(tile_n), 128))
    tn = min(tn, _round_up(int(n_entity), 128))
    npad = _round_up(int(n_entity), tn)
    return tn, npad


# ----------------------------------------------------------------------------
# In-kernel helpers
# ----------------------------------------------------------------------------
def _gate(g, x1, x2, gw1_ref, gvec_ref):
    """GateLayer (is_minus=False), concat-free.
    gw1_ref: [3, 2, d, d]  (W1.T split into x1/x2 halves)
    gvec_ref: [3, 3, d]    (slot 0 = b1, slot 1 = w2 row, slot 2 = b2 broadcast)."""
    w1a = gw1_ref[g, 0]                       # [d, d]
    w1b = gw1_ref[g, 1]                       # [d, d]
    b1 = gvec_ref[g, 0:1, :]                  # [1, d]
    w2 = gvec_ref[g, 1:2, :]                  # [1, d]
    b2 = gvec_ref[g, 2:3, 0:1]                # [1, 1]
    norm = (jnp.dot(x1, w1a, preferred_element_type=jnp.float32)
            + jnp.dot(x2, w1b, preferred_element_type=jnp.float32) + b1)
    t = jnp.tanh(norm)
    # N=1 "matmul" as VPU multiply + lane reduce (keeps the MXU free).
    z = jnp.sum(t * w2, axis=-1, keepdims=True) + b2          # [bs, 1]
    gate = jax.nn.sigmoid(z)
    return gate * x1 + (1.0 - gate) * x2


def _barlow(v1, v2, mu):
    """compute_barrow_loss -> combined loss  mu*diag_loss + (1-mu)*offdiag_loss."""
    bs = v1.shape[0]
    # v1 @ v2.T without an explicit transpose of v2 (contract last dims).
    cov_up = lax.dot_general(v1, v2, (((1,), (1,)), ((), ())),
                             preferred_element_type=jnp.float32)       # [bs, bs]
    w_down = jnp.sum(v1 * v1, axis=1, keepdims=True)                   # [bs, 1]
    e_down = jnp.sum(v2 * v2, axis=1, keepdims=True)                   # [bs, 1]
    cov = cov_up / jnp.sqrt(w_down * e_down.T + 1e-12)                 # [bs, bs]
    # Diagonal computed row-wise (no iota / masked select over [bs, bs]).
    diag = (jnp.sum(v1 * v2, axis=1, keepdims=True)
            / jnp.sqrt(w_down * e_down + 1e-12))                       # [bs, 1]
    s_diag = jnp.sum(diag)
    s_diag_sq = jnp.sum(diag * diag)
    s_all = jnp.sum(cov * cov)
    lp1 = jnp.float32(bs) - 2.0 * s_diag + s_diag_sq   # sum_i (1 - cov_ii)^2
    lp2 = s_all - s_diag_sq                            # sum_{i != j} cov_ij^2
    return mu * lp1 + (1.0 - mu) * lp2


# ----------------------------------------------------------------------------
# Fused / tiled Pallas kernel
# ----------------------------------------------------------------------------
def cross_model_kernel(acts_ref, gw1_ref, gvec_ref, ent_t_ref, bias_ref,
                       scores_ref, lse_ref, losses_ref,
                       user_sc, m_sc, l_sc):
    j = pl.program_id(0)

    # ---- preamble: barlow losses + 3 gates, computed once, kept in VMEM ----
    @pl.when(j == 0)
    def _():
        x_cur = acts_ref[0]
        x_db = acts_ref[1]
        x_simi = acts_ref[2]
        x_con = acts_ref[3]

        # _, _, info_cur_h_loss = compute_barrow_loss(db_user_emb_cur, db_user_emb, 0.13)
        info_cur_h_loss = _barlow(x_cur, x_db, 0.13)
        # db_user_emb = gate_layer2(db_user_emb_cur, db_user_emb)
        db = _gate(1, x_cur, x_db, gw1_ref, gvec_ref)
        # db_user_emb = gate_layer3(simi_user_emb, db_user_emb)
        db = _gate(2, x_simi, db, gw1_ref, gvec_ref)
        # _, info_con_loss, info_db_loss = compute_barrow_loss(db_user_emb, con_user_emb, 0.99)
        info_db_loss = _barlow(db, x_con, 0.99)
        # user_emb = gate_layer1(db_user_emb, con_user_emb)
        user = _gate(0, db, x_con, gw1_ref, gvec_ref)

        user_sc[...] = user.astype(user_sc.dtype)          # bf16 for the MXU stream
        m_sc[...] = jnp.full(m_sc.shape, -jnp.inf, m_sc.dtype)
        l_sc[...] = jnp.zeros(l_sc.shape, l_sc.dtype)
        losses_ref[0] = info_db_loss
        losses_ref[1] = info_cur_h_loss

    # ---- streamed entity scoring + online logsumexp over this tile ----
    # entity_scores = F.linear(user_emb, db_nodes_features, output_en.bias)
    s = (jnp.dot(user_sc[...], ent_t_ref[...],
                 preferred_element_type=jnp.float32) + bias_ref[...])  # [bs, TN] f32
    scores_ref[...] = s

    m_prev = m_sc[...]
    m_new = jnp.maximum(m_prev, jnp.max(s, axis=-1, keepdims=True))
    l_sc[...] = (jnp.exp(m_prev - m_new) * l_sc[...]
                 + jnp.sum(jnp.exp(s - m_new), axis=-1, keepdims=True))
    m_sc[...] = m_new

    @pl.when(j == pl.num_programs(0) - 1)
    def _():
        lse_ref[...] = m_sc[...] + jnp.log(l_sc[...])


# ----------------------------------------------------------------------------
# Parameter pre-packing (done ONCE, outside the hot path)
# ----------------------------------------------------------------------------
def pack_gate_stacks(params, dim):
    """gw1: [3,2,d,d] (W1.T halves), gvec: [3,3,d] (b1 / w2 / b2-broadcast).
    Gate order: index 0 = gate_layer1, 1 = gate_layer2, 2 = gate_layer3."""
    gw1, gvec = [], []
    for name in ("gate1", "gate2", "gate3"):
        w1, b1, w2, b2 = params[name]
        w1t = jnp.asarray(w1, jnp.float32).T                         # [2d, d]
        gw1.append(jnp.stack([w1t[:dim], w1t[dim:]], axis=0))        # [2, d, d]
        gvec.append(jnp.stack([
            jnp.asarray(b1, jnp.float32).reshape(dim),
            jnp.asarray(w2, jnp.float32).reshape(dim),
            jnp.full((dim,), float(np.asarray(b2).reshape(())), jnp.float32),
        ], axis=0))                                                  # [3, d]
    return jnp.stack(gw1, 0), jnp.stack(gvec, 0)


def pack_params(params, db_nodes_features, *, tile_n=TILE_N_DEFAULT):
    ent = jnp.asarray(db_nodes_features, jnp.float32)
    n_entity, dim = ent.shape
    tn, npad = _entity_tiling(n_entity, tile_n)
    # bf16 entity table halves the dominant HBM read; padded columns are zero.
    ent_t = jnp.zeros((dim, npad), jnp.bfloat16)
    ent_t = ent_t.at[:, :n_entity].set(ent.T.astype(jnp.bfloat16))
    # Bias padded with a large negative value so padded lanes drop out of the LSE.
    bias = jnp.full((1, npad), _NEG_PAD, jnp.float32)
    bias = bias.at[0, :n_entity].set(jnp.asarray(params["output_en_bias"], jnp.float32))
    gw1, gvec = pack_gate_stacks(params, dim)
    return {"gw1": gw1, "gvec": gvec, "ent_t": ent_t, "bias": bias}


# ----------------------------------------------------------------------------
# Forward wrapper (pallas_call plumbing + tiny XLA epilogue)
# ----------------------------------------------------------------------------
def cross_model_forward(packed, db_user_emb_cur, db_user_emb, simi_user_emb,
                        con_user_emb, labels, rec, *, n_entity,
                        tile_n=TILE_N_DEFAULT):
    """Mirrors CrossModel.forward() after the graph/attention pooling stage."""
    bs, dim = db_user_emb_cur.shape
    tn, npad = _entity_tiling(n_entity, tile_n)
    assert packed["ent_t"].shape == (dim, npad), "pack_params/forward tile_n mismatch"
    grid = (npad // tn,)

    acts = jnp.stack([db_user_emb_cur, db_user_emb, simi_user_emb, con_user_emb],
                     axis=0).astype(jnp.float32)                      # [4, bs, d]

    scores_pad, lse, losses = pl.pallas_call(
        cross_model_kernel,
        out_shape=(jax.ShapeDtypeStruct((bs, npad), jnp.float32),
                   jax.ShapeDtypeStruct((bs, 1), jnp.float32),
                   jax.ShapeDtypeStruct((2,), jnp.float32)),
        grid=grid,
        in_specs=[
            pl.BlockSpec((4, bs, dim), lambda j: (0, 0, 0)),          # resident
            pl.BlockSpec((3, 2, dim, dim), lambda j: (0, 0, 0, 0)),   # resident
            pl.BlockSpec((3, 3, dim), lambda j: (0, 0, 0)),           # resident
            pl.BlockSpec((dim, tn), lambda j: (0, j)),                # streamed (bf16)
            pl.BlockSpec((1, tn), lambda j: (0, j)),                  # streamed
        ],
        out_specs=(
            pl.BlockSpec((bs, tn), lambda j: (0, j)),                 # streamed out
            pl.BlockSpec((bs, 1), lambda j: (0, 0)),                  # final LSE
            pl.BlockSpec(memory_space=pltpu.MemorySpace.SMEM),        # barlow losses
        ),
        scratch_shapes=[
            pltpu.VMEM((bs, dim), jnp.bfloat16),    # persistent gated user emb
            pltpu.VMEM((bs, 1), jnp.float32),       # online-LSE running max
            pltpu.VMEM((bs, 1), jnp.float32),       # online-LSE running sum
        ],
        compiler_params=pltpu.CompilerParams(
            dimension_semantics=("arbitrary",),     # online LSE carries across tiles
            vmem_limit_bytes=32 * 1024 * 1024),
    )(acts, packed["gw1"], packed["gvec"], packed["ent_t"], packed["bias"])

    entity_scores = scores_pad[:, :n_entity]
    # rec_loss = sum_i rec_i * CE(entity_scores[i], labels[i]): label gather on the
    # already-materialized scores, LSE computed online in-kernel.
    picked = jnp.take_along_axis(entity_scores,
                                 labels.astype(jnp.int32)[:, None], axis=1)[:, 0]
    rec_loss = jnp.sum((lse[:, 0] - picked) * rec.astype(jnp.float32))

    info_db_loss = losses[0]
    info_cur_h_loss = losses[1]
    scores_out, preds, conv_loss, mask_loss = None, None, None, 0.0
    return (scores_out, preds, entity_scores, rec_loss, conv_loss, mask_loss,
            info_db_loss, info_cur_h_loss)


# ----------------------------------------------------------------------------
# Pure-JAX reference (numerical sanity check, f32 throughout)
# ----------------------------------------------------------------------------
def _ref_gate(x1, x2, p):
    w1, b1, w2, b2 = p
    norm = jnp.concatenate([x1, x2], axis=-1) @ w1.T + b1
    g = jax.nn.sigmoid(jnp.tanh(norm) @ w2.T + b2)
    return g * x1 + (1.0 - g) * x2


def _ref_barlow(v1, v2, mu):
    up = v1 @ v2.T
    wd = jnp.sum(v1 * v1, axis=1)[:, None]
    ed = jnp.sum(v2 * v2, axis=1)[None, :]
    cov = up / jnp.sqrt(wd * ed + 1e-12)
    bs = v1.shape[0]
    eye = jnp.eye(bs, dtype=jnp.float32)
    lp1 = jnp.sum(jnp.diag(eye - cov) ** 2)
    lp2 = jnp.sum(((1.0 - eye) * cov) ** 2)
    return mu * lp1 + (1.0 - mu) * lp2


def _ref_forward(params, cur, db, simi, con, ent, labels, rec):
    cur_h = _ref_barlow(cur, db, 0.13)
    db = _ref_gate(cur, db, params["gate2"])
    db = _ref_gate(simi, db, params["gate3"])
    info_db = _ref_barlow(db, con, 0.99)
    user = _ref_gate(db, con, params["gate1"])
    scores = user @ ent.T + params["output_en_bias"]
    lse = jax.scipy.special.logsumexp(scores, axis=-1)
    ce = lse - scores[jnp.arange(scores.shape[0]), labels]
    rec_loss = jnp.sum(ce * rec)
    return scores, rec_loss, info_db, cur_h


# ----------------------------------------------------------------------------
# Main
# ----------------------------------------------------------------------------
def _linear_params(key, out_dim, in_dim):
    k1, k2 = jax.random.split(key)
    bound = 1.0 / np.sqrt(in_dim)
    w = jax.random.uniform(k1, (out_dim, in_dim), jnp.float32, -bound, bound)
    b = jax.random.uniform(k2, (out_dim,), jnp.float32, -bound, bound)
    return w, b


def _gate_params(key, dim):
    k1, k2 = jax.random.split(key)
    w1, b1 = _linear_params(k1, dim, 2 * dim)   # _norm_layer1
    w2, b2 = _linear_params(k2, 1, dim)         # _norm_layer2
    return (w1, b1, w2, b2)


if __name__ == "__main__":
    # Small shapes; n_entity deliberately NOT a multiple of 128 and larger than
    # the tile so the padded, multi-step streamed path is exercised.
    bs, dim, n_entity, tile_n = 8, 64, 1000, 256

    root = jax.random.PRNGKey(0)
    keys = jax.random.split(root, 12)

    params = {
        "gate1": _gate_params(keys[0], dim),
        "gate2": _gate_params(keys[1], dim),
        "gate3": _gate_params(keys[2], dim),
        "output_en_bias": _linear_params(keys[3], n_entity, dim)[1],
    }

    # Synthetic stand-ins for the graph-encoder / self-attention pooled features.
    db_nodes_features = jax.random.normal(keys[4], (n_entity, dim), jnp.float32)
    db_user_emb_cur = jax.random.normal(keys[5], (bs, dim), jnp.float32)
    db_user_emb = jax.random.normal(keys[6], (bs, dim), jnp.float32)
    simi_user_emb = jax.random.normal(keys[7], (bs, dim), jnp.float32)
    con_user_emb = jax.random.normal(keys[8], (bs, dim), jnp.float32)
    labels = jax.random.randint(keys[9], (bs,), 0, n_entity, jnp.int32)
    rec = jax.random.bernoulli(keys[10], 0.7, (bs,)).astype(jnp.float32)

    # Pre-pack weights / padded bf16 entity table ONCE, outside the hot path.
    packed = pack_params(params, db_nodes_features, tile_n=tile_n)

    fwd = jax.jit(functools.partial(cross_model_forward,
                                    n_entity=n_entity, tile_n=tile_n))
    out = fwd(packed, db_user_emb_cur, db_user_emb, simi_user_emb,
              con_user_emb, labels, rec)
    out = jax.block_until_ready(out)
    (_, _, entity_scores, rec_loss, _, _, info_db_loss, info_cur_h_loss) = out

    ref_scores, ref_rec_loss, ref_info_db, ref_cur_h = _ref_forward(
        params, db_user_emb_cur, db_user_emb, simi_user_emb,
        con_user_emb, db_nodes_features, labels, rec)

    # Entity table / user emb are bf16 in the kernel (f32 accumulation): compare
    # against the pure-f32 reference with a correspondingly loosened atol.
    np.testing.assert_allclose(np.asarray(entity_scores), np.asarray(ref_scores),
                               rtol=2e-2, atol=1e-1)
    np.testing.assert_allclose(float(rec_loss), float(ref_rec_loss),
                               rtol=2e-2, atol=1e-1)
    np.testing.assert_allclose(float(info_db_loss), float(ref_info_db),
                               rtol=2e-2, atol=2e-2)
    np.testing.assert_allclose(float(info_cur_h_loss), float(ref_cur_h),
                               rtol=2e-2, atol=2e-2)

    print("KERNEL_OK")
</pallas_src>

<mosaic_0001>
module attributes {stable_mosaic.version = 11 : i64} {
  func.func @cross_model_kernel(%arg0: i32, %arg1: memref<4x8x64xf32, #tpu.memory_space<vmem>>, %arg2: memref<3x2x64x64xf32, #tpu.memory_space<vmem>>, %arg3: memref<3x3x64xf32, #tpu.memory_space<vmem>>, %arg4: memref<64x256xbf16, #tpu.memory_space<vmem>>, %arg5: memref<1x256xf32, #tpu.memory_space<vmem>>, %arg6: memref<8x256xf32, #tpu.memory_space<vmem>>, %arg7: memref<8x1xf32, #tpu.memory_space<vmem>>, %arg8: memref<2xf32, #tpu.memory_space<smem>>, %arg9: memref<8x64xbf16, #tpu.memory_space<vmem>>, %arg10: memref<8x1xf32, #tpu.memory_space<vmem>>, %arg11: memref<8x1xf32, #tpu.memory_space<vmem>>) attributes {dimension_semantics = [#tpu.dimension_semantics<arbitrary>], iteration_bounds = array<i64: 4>, scalar_prefetch = 0 : i64, scratch_operands = 3 : i64, tpu.core_type = #tpu.core_type<tc>, window_params = [{pipeline_mode = #tpu.pipeline_mode<synchronous>, transform_indices = @transform_0, window_bounds = array<i64: 4, 8, 64>}, {pipeline_mode = #tpu.pipeline_mode<synchronous>, transform_indices = @transform_1, window_bounds = array<i64: 3, 2, 64, 64>}, {pipeline_mode = #tpu.pipeline_mode<synchronous>, transform_indices = @transform_2, window_bounds = array<i64: 3, 3, 64>}, {transform_indices = @transform_3, window_bounds = array<i64: 64, 256>}, {transform_indices = @transform_4, window_bounds = array<i64: 1, 256>}, {transform_indices = @transform_5, window_bounds = array<i64: 8, 256>}, {pipeline_mode = #tpu.pipeline_mode<synchronous>, transform_indices = @transform_6, window_bounds = array<i64: 8, 1>}, {transform_indices = @transform_7, window_bounds = array<i64: 2>}]} {
    %c0_i32 = arith.constant 0 : i32
    %0 = arith.cmpi eq, %arg0, %c0_i32 : i32
    %1 = arith.extui %0 : i1 to i32
    %c0_i32_0 = arith.constant 0 : i32
    %2 = arith.cmpi ne, %1, %c0_i32_0 : i32
    scf.if %2 {
      %c0_19 = arith.constant 0 : index
      %c0_20 = arith.constant 0 : index
      %c0_21 = arith.constant 0 : index
      %29 = vector.load %arg1[%c0_19, %c0_20, %c0_21] : memref<4x8x64xf32, #tpu.memory_space<vmem>>, vector<1x8x64xf32>
      %30 = vector.shape_cast %29 : vector<1x8x64xf32> to vector<8x64xf32>
      %c1 = arith.constant 1 : index
      %c0_22 = arith.constant 0 : index
      %c0_23 = arith.constant 0 : index
      %31 = vector.load %arg1[%c1, %c0_22, %c0_23] : memref<4x8x64xf32, #tpu.memory_space<vmem>>, vector<1x8x64xf32>
      %32 = vector.shape_cast %31 : vector<1x8x64xf32> to vector<8x64xf32>
      %c2 = arith.constant 2 : index
      %c0_24 = arith.constant 0 : index
      %c0_25 = arith.constant 0 : index
      %33 = vector.load %arg1[%c2, %c0_24, %c0_25] : memref<4x8x64xf32, #tpu.memory_space<vmem>>, vector<1x8x64xf32>
      %34 = vector.shape_cast %33 : vector<1x8x64xf32> to vector<8x64xf32>
      %c3 = arith.constant 3 : index
      %c0_26 = arith.constant 0 : index
      %c0_27 = arith.constant 0 : index
      %35 = vector.load %arg1[%c3, %c0_26, %c0_27] : memref<4x8x64xf32, #tpu.memory_space<vmem>>, vector<1x8x64xf32>
      %36 = vector.shape_cast %35 : vector<1x8x64xf32> to vector<8x64xf32>
      %cst_28 = arith.constant dense<0.000000e+00> : vector<8x8xf32>
      %37 = tpu.matmul %30, %32, %cst_28 {dimension_numbers = #tpu.dot_dimension_numbers<[1], [1], [0], [0], [0, 0, 1, 0], [], []>} : vector<8x64xf32>, vector<8x64xf32>, vector<8x8xf32> -> vector<8x8xf32>
      %38 = arith.mulf %30, %30 : vector<8x64xf32>
      %cst_29 = arith.constant dense<0.000000e+00> : vector<8xf32>
      %39 = vector.multi_reduction <add>, %38, %cst_29 [1] : vector<8x64xf32> to vector<8xf32>
      %40 = vector.shape_cast %39 : vector<8xf32> to vector<8x1xf32>
      %41 = arith.mulf %32, %32 : vector<8x64xf32>
      %cst_30 = arith.constant dense<0.000000e+00> : vector<8xf32>
      %42 = vector.multi_reduction <add>, %41, %cst_30 [1] : vector<8x64xf32> to vector<8xf32>
      %43 = vector.shape_cast %42 : vector<8xf32> to vector<8x1xf32>
      %44 = tpu.transpose %43, [1, 0] : vector<8x1xf32> -> vector<1x8xf32>
      %45 = vector.broadcast %40 : vector<8x1xf32> to vector<8x8xf32>
      %46 = vector.broadcast %44 : vector<1x8xf32> to vector<8x8xf32>
      %47 = arith.mulf %45, %46 : vector<8x8xf32>
      %cst_31 = arith.constant 9.99999996E-13 : f32
      %48 = vector.broadcast %cst_31 : f32 to vector<8x8xf32>
      %49 = arith.addf %47, %48 : vector<8x8xf32>
      %50 = math.sqrt %49 : vector<8x8xf32>
      %51 = arith.divf %37, %50 : vector<8x8xf32>
      %52 = arith.mulf %30, %32 : vector<8x64xf32>
      %cst_32 = arith.constant dense<0.000000e+00> : vector<8xf32>
      %53 = vector.multi_reduction <add>, %52, %cst_32 [1] : vector<8x64xf32> to vector<8xf32>
      %54 = vector.shape_cast %53 : vector<8xf32> to vector<8x1xf32>
      %55 = arith.mulf %40, %43 : vector<8x1xf32>
      %cst_33 = arith.constant 9.99999996E-13 : f32
      %56 = vector.broadcast %cst_33 : f32 to vector<8x1xf32>
      %57 = arith.addf %55, %56 : vector<8x1xf32>
      %58 = math.sqrt %57 : vector<8x1xf32>
      %59 = arith.divf %54, %58 : vector<8x1xf32>
      %60 = vector.shape_cast %59 : vector<8x1xf32> to vector<1x8x1xf32>
      %cst_34 = arith.constant dense<0.000000e+00> : vector<1xf32>
      %61 = vector.multi_reduction <add>, %60, %cst_34 [1, 2] : vector<1x8x1xf32> to vector<1xf32>
      %62 = vector.shape_cast %61 : vector<1xf32> to vector<1x1x1xf32>
      %63 = vector.extract %62[0, 0, 0] : f32 from vector<1x1x1xf32>
      %64 = arith.mulf %59, %59 : vector<8x1xf32>
      %65 = vector.shape_cast %64 : vector<8x1xf32> to vector<1x8x1xf32>
      %cst_35 = arith.constant dense<0.000000e+00> : vector<1xf32>
      %66 = vector.multi_reduction <add>, %65, %cst_35 [1, 2] : vector<1x8x1xf32> to vector<1xf32>
      %67 = vector.shape_cast %66 : vector<1xf32> to vector<1x1x1xf32>
      %68 = vector.extract %67[0, 0, 0] : f32 from vector<1x1x1xf32>
      %69 = arith.mulf %51, %51 : vector<8x8xf32>
      %70 = vector.shape_cast %69 : vector<8x8xf32> to vector<1x8x8xf32>
      %cst_36 = arith.constant dense<0.000000e+00> : vector<1xf32>
      %71 = vector.multi_reduction <add>, %70, %cst_36 [1, 2] : vector<1x8x8xf32> to vector<1xf32>
      %72 = vector.shape_cast %71 : vector<1xf32> to vector<1x1x1xf32>
      %73 = vector.extract %72[0, 0, 0] : f32 from vector<1x1x1xf32>
      %cst_37 = arith.constant 2.000000e+00 : f32
      %74 = arith.mulf %cst_37, %63 : f32
      %cst_38 = arith.constant 8.000000e+00 : f32
      %75 = arith.subf %cst_38, %74 : f32
      %76 = arith.addf %75, %68 : f32
      %77 = arith.subf %73, %68 : f32
      %cst_39 = arith.constant 1.300000e-01 : f32
      %78 = arith.mulf %cst_39, %76 : f32
      %cst_40 = arith.constant 8.700000e-01 : f32
      %79 = arith.mulf %cst_40, %77 : f32
      %80 = arith.addf %78, %79 : f32
      %c1_41 = arith.constant 1 : index
      %c0_42 = arith.constant 0 : index
      %c0_43 = arith.constant 0 : index
      %c0_44 = arith.constant 0 : index
      %81 = vector.load %arg2[%c1_41, %c0_42, %c0_43, %c0_44] : memref<3x2x64x64xf32, #tpu.memory_space<vmem>>, vector<1x1x64x64xf32>
      %82 = vector.shape_cast %81 : vector<1x1x64x64xf32> to vector<64x64xf32>
      %c1_45 = arith.constant 1 : index
      %c1_46 = arith.constant 1 : index
      %c0_47 = arith.constant 0 : index
      %c0_48 = arith.constant 0 : index
      %83 = vector.load %arg2[%c1_45, %c1_46, %c0_47, %c0_48] : memref<3x2x64x64xf32, #tpu.memory_space<vmem>>, vector<1x1x64x64xf32>
      %84 = vector.shape_cast %83 : vector<1x1x64x64xf32> to vector<64x64xf32>
      %c1_49 = arith.constant 1 : index
      %c0_50 = arith.constant 0 : index
      %c0_51 = arith.constant 0 : index
      %85 = vector.load %arg3[%c1_49, %c0_50, %c0_51] : memref<3x3x64xf32, #tpu.memory_space<vmem>>, vector<1x1x64xf32>
      %86 = vector.shape_cast %85 : vector<1x1x64xf32> to vector<1x64xf32>
      %c1_52 = arith.constant 1 : index
      %c1_53 = arith.constant 1 : index
      %c0_54 = arith.constant 0 : index
      %87 = vector.load %arg3[%c1_52, %c1_53, %c0_54] : memref<3x3x64xf32, #tpu.memory_space<vmem>>, vector<1x1x64xf32>
      %88 = vector.shape_cast %87 : vector<1x1x64xf32> to vector<1x64xf32>
      %c1_55 = arith.constant 1 : index
      %c2_56 = arith.constant 2 : index
      %c0_57 = arith.constant 0 : index
      %89 = vector.load %arg3[%c1_55, %c2_56, %c0_57] : memref<3x3x64xf32, #tpu.memory_space<vmem>>, vector<1x1x1xf32>
      %90 = vector.shape_cast %89 : vector<1x1x1xf32> to vector<1x1xf32>
      %cst_58 = arith.constant dense<0.000000e+00> : vector<8x64xf32>
      %91 = tpu.matmul %30, %82, %cst_58 {dimension_numbers = #tpu.dot_dimension_numbers<[1], [0], [0], [1], [0, 0, 1, 1], [], []>} : vector<8x64xf32>, vector<64x64xf32>, vector<8x64xf32> -> vector<8x64xf32>
      %cst_59 = arith.constant dense<0.000000e+00> : vector<8x64xf32>
      %92 = tpu.matmul %32, %84, %cst_59 {dimension_numbers = #tpu.dot_dimension_numbers<[1], [0], [0], [1], [0, 0, 1, 1], [], []>} : vector<8x64xf32>, vector<64x64xf32>, vector<8x64xf32> -> vector<8x64xf32>
      %93 = arith.addf %91, %92 : vector<8x64xf32>
      %94 = vector.broadcast %86 : vector<1x64xf32> to vector<8x64xf32>
      %95 = arith.addf %93, %94 : vector<8x64xf32>
      %96 = math.tanh %95 : vector<8x64xf32>
      %97 = vector.broadcast %88 : vector<1x64xf32> to vector<8x64xf32>
      %98 = arith.mulf %96, %97 : vector<8x64xf32>
      %cst_60 = arith.constant dense<0.000000e+00> : vector<8xf32>
      %99 = vector.multi_reduction <add>, %98, %cst_60 [1] : vector<8x64xf32> to vector<8xf32>
      %100 = vector.shape_cast %99 : vector<8xf32> to vector<8x1xf32>
      %101 = vector.broadcast %90 : vector<1x1xf32> to vector<8x1xf32>
      %102 = arith.addf %100, %101 : vector<8x1xf32>
      %103 = arith.negf %102 : vector<8x1xf32>
      %104 = math.exp %103 : vector<8x1xf32>
      %cst_61 = arith.constant 1.000000e+00 : f32
      %105 = vector.broadcast %cst_61 : f32 to vector<8x1xf32>
      %106 = arith.addf %105, %104 : vector<8x1xf32>
      %107 = arith.divf %105, %106 : vector<8x1xf32>
      %108 = vector.broadcast %107 : vector<8x1xf32> to vector<8x64xf32>
      %109 = arith.mulf %108, %30 : vector<8x64xf32>
      %cst_62 = arith.constant 1.000000e+00 : f32
      %110 = vector.broadcast %cst_62 : f32 to vector<8x1xf32>
      %111 = arith.subf %110, %107 : vector<8x1xf32>
      %112 = vector.broadcast %111 : vector<8x1xf32> to vector<8x64xf32>
      %113 = arith.mulf %112, %32 : vector<8x64xf32>
      %114 = arith.addf %109, %113 : vector<8x64xf32>
      %c2_63 = arith.constant 2 : index
      %c0_64 = arith.constant 0 : index
      %c0_65 = arith.constant 0 : index
      %c0_66 = arith.constant 0 : index
      %115 = vector.load %arg2[%c2_63, %c0_64, %c0_65, %c0_66] : memref<3x2x64x64xf32, #tpu.memory_space<vmem>>, vector<1x1x64x64xf32>
      %116 = vector.shape_cast %115 : vector<1x1x64x64xf32> to vector<64x64xf32>
      %c2_67 = arith.constant 2 : index
      %c1_68 = arith.constant 1 : index
      %c0_69 = arith.constant 0 : index
      %c0_70 = arith.constant 0 : index
      %117 = vector.load %arg2[%c2_67, %c1_68, %c0_69, %c0_70] : memref<3x2x64x64xf32, #tpu.memory_space<vmem>>, vector<1x1x64x64xf32>
      %118 = vector.shape_cast %117 : vector<1x1x64x64xf32> to vector<64x64xf32>
      %c2_71 = arith.constant 2 : index
      %c0_72 = arith.constant 0 : index
      %c0_73 = arith.constant 0 : index
      %119 = vector.load %arg3[%c2_71, %c0_72, %c0_73] : memref<3x3x64xf32, #tpu.memory_space<vmem>>, vector<1x1x64xf32>
      %120 = vector.shape_cast %119 : vector<1x1x64xf32> to vector<1x64xf32>
      %c2_74 = arith.constant 2 : index
      %c1_75 = arith.constant 1 : index
      %c0_76 = arith.constant 0 : index
      %121 = vector.load %arg3[%c2_74, %c1_75, %c0_76] : memref<3x3x64xf32, #tpu.memory_space<vmem>>, vector<1x1x64xf32>
      %122 = vector.shape_cast %121 : vector<1x1x64xf32> to vector<1x64xf32>
      %c2_77 = arith.constant 2 : index
      %c2_78 = arith.constant 2 : index
      %c0_79 = arith.constant 0 : index
      %123 = vector.load %arg3[%c2_77, %c2_78, %c0_79] : memref<3x3x64xf32, #tpu.memory_space<vmem>>, vector<1x1x1xf32>
      %124 = vector.shape_cast %123 : vector<1x1x1xf32> to vector<1x1xf32>
      %cst_80 = arith.constant dense<0.000000e+00> : vector<8x64xf32>
      %125 = tpu.matmul %34, %116, %cst_80 {dimension_numbers = #tpu.dot_dimension_numbers<[1], [0], [0], [1], [0, 0, 1, 1], [], []>} : vector<8x64xf32>, vector<64x64xf32>, vector<8x64xf32> -> vector<8x64xf32>
      %cst_81 = arith.constant dense<0.000000e+00> : vector<8x64xf32>
      %126 = tpu.matmul %114, %118, %cst_81 {dimension_numbers = #tpu.dot_dimension_numbers<[1], [0], [0], [1], [0, 0, 1, 1], [], []>} : vector<8x64xf32>, vector<64x64xf32>, vector<8x64xf32> -> vector<8x64xf32>
      %127 = arith.addf %125, %126 : vector<8x64xf32>
      %128 = vector.broadcast %120 : vector<1x64xf32> to vector<8x64xf32>
      %129 = arith.addf %127, %128 : vector<8x64xf32>
      %130 = math.tanh %129 : vector<8x64xf32>
      %131 = vector.broadcast %122 : vector<1x64xf32> to vector<8x64xf32>
      %132 = arith.mulf %130, %131 : vector<8x64xf32>
      %cst_82 = arith.constant dense<0.000000e+00> : vector<8xf32>
      %133 = vector.multi_reduction <add>, %132, %cst_82 [1] : vector<8x64xf32> to vector<8xf32>
      %134 = vector.shape_cast %133 : vector<8xf32> to vector<8x1xf32>
      %135 = vector.broadcast %124 : vector<1x1xf32> to vector<8x1xf32>
      %136 = arith.addf %134, %135 : vector<8x1xf32>
      %137 = arith.negf %136 : vector<8x1xf32>
      %138 = math.exp %137 : vector<8x1xf32>
      %cst_83 = arith.constant 1.000000e+00 : f32
      %139 = vector.broadcast %cst_83 : f32 to vector<8x1xf32>
      %140 = arith.addf %139, %138 : vector<8x1xf32>
      %141 = arith.divf %139, %140 : vector<8x1xf32>
      %142 = vector.broadcast %141 : vector<8x1xf32> to vector<8x64xf32>
      %143 = arith.mulf %142, %34 : vector<8x64xf32>
      %cst_84 = arith.constant 1.000000e+00 : f32
      %144 = vector.broadcast %cst_84 : f32 to vector<8x1xf32>
      %145 = arith.subf %144, %141 : vector<8x1xf32>
      %146 = vector.broadcast %145 : vector<8x1xf32> to vector<8x64xf32>
      %147 = arith.mulf %146, %114 : vector<8x64xf32>
      %148 = arith.addf %143, %147 : vector<8x64xf32>
      %cst_85 = arith.constant dense<0.000000e+00> : vector<8x8xf32>
      %149 = tpu.matmul %148, %36, %cst_85 {dimension_numbers = #tpu.dot_dimension_numbers<[1], [1], [0], [0], [0, 0, 1, 0], [], []>} : vector<8x64xf32>, vector<8x64xf32>, vector<8x8xf32> -> vector<8x8xf32>
      %150 = arith.mulf %148, %148 : vector<8x64xf32>
      %cst_86 = arith.constant dense<0.000000e+00> : vector<8xf32>
      %151 = vector.multi_reduction <add>, %150, %cst_86 [1] : vector<8x64xf32> to vector<8xf32>
      %152 = vector.shape_cast %151 : vector<8xf32> to vector<8x1xf32>
      %153 = arith.mulf %36, %36 : vector<8x64xf32>
      %cst_87 = arith.constant dense<0.000000e+00> : vector<8xf32>
      %154 = vector.multi_reduction <add>, %153, %cst_87 [1] : vector<8x64xf32> to vector<8xf32>
      %155 = vector.shape_cast %154 : vector<8xf32> to vector<8x1xf32>
      %156 = tpu.transpose %155, [1, 0] : vector<8x1xf32> -> vector<1x8xf32>
      %157 = vector.broadcast %152 : vector<8x1xf32> to vector<8x8xf32>
      %158 = vector.broadcast %156 : vector<1x8xf32> to vector<8x8xf32>
      %159 = arith.mulf %157, %158 : vector<8x8xf32>
      %cst_88 = arith.constant 9.99999996E-13 : f32
      %160 = vector.broadcast %cst_88 : f32 to vector<8x8xf32>
      %161 = arith.addf %159, %160 : vector<8x8xf32>
      %162 = math.sqrt %161 : vector<8x8xf32>
      %163 = arith.divf %149, %162 : vector<8x8xf32>
      %164 = arith.mulf %148, %36 : vector<8x64xf32>
      %cst_89 = arith.constant dense<0.000000e+00> : vector<8xf32>
      %165 = vector.multi_reduction <add>, %164, %cst_89 [1] : vector<8x64xf32> to vector<8xf32>
      %166 = vector.shape_cast %165 : vector<8xf32> to vector<8x1xf32>
      %167 = arith.mulf %152, %155 : vector<8x1xf32>
      %cst_90 = arith.constant 9.99999996E-13 : f32
      %168 = vector.broadcast %cst_90 : f32 to vector<8x1xf32>
      %169 = arith.addf %167, %168 : vector<8x1xf32>
      %170 = math.sqrt %169 : vector<8x1xf32>
      %171 = arith.divf %166, %170 : vector<8x1xf32>
      %172 = vector.shape_cast %171 : vector<8x1xf32> to vector<1x8x1xf32>
      %cst_91 = arith.constant dense<0.000000e+00> : vector<1xf32>
      %173 = vector.multi_reduction <add>, %172, %cst_91 [1, 2] : vector<1x8x1xf32> to vector<1xf32>
      %174 = vector.shape_cast %173 : vector<1xf32> to vector<1x1x1xf32>
      %175 = vector.extract %174[0, 0, 0] : f32 from vector<1x1x1xf32>
      %176 = arith.mulf %171, %171 : vector<8x1xf32>
      %177 = vector.shape_cast %176 : vector<8x1xf32> to vector<1x8x1xf32>
      %cst_92 = arith.constant dense<0.000000e+00> : vector<1xf32>
      %178 = vector.multi_reduction <add>, %177, %cst_92 [1, 2] : vector<1x8x1xf32> to vector<1xf32>
      %179 = vector.shape_cast %178 : vector<1xf32> to vector<1x1x1xf32>
      %180 = vector.extract %179[0, 0, 0] : f32 from vector<1x1x1xf32>
      %181 = arith.mulf %163, %163 : vector<8x8xf32>
      %182 = vector.shape_cast %181 : vector<8x8xf32> to vector<1x8x8xf32>
      %cst_93 = arith.constant dense<0.000000e+00> : vector<1xf32>
      %183 = vector.multi_reduction <add>, %182, %cst_93 [1, 2] : vector<1x8x8xf32> to vector<1xf32>
      %184 = vector.shape_cast %183 : vector<1xf32> to vector<1x1x1xf32>
      %185 = vector.extract %184[0, 0, 0] : f32 from vector<1x1x1xf32>
      %cst_94 = arith.constant 2.000000e+00 : f32
      %186 = arith.mulf %cst_94, %175 : f32
      %cst_95 = arith.constant 8.000000e+00 : f32
      %187 = arith.subf %cst_95, %186 : f32
      %188 = arith.addf %187, %180 : f32
      %189 = arith.subf %185, %180 : f32
      %cst_96 = arith.constant 9.900000e-01 : f32
      %190 = arith.mulf %cst_96, %188 : f32
      %cst_97 = arith.constant 0.00999999977 : f32
      %191 = arith.mulf %cst_97, %189 : f32
      %192 = arith.addf %190, %191 : f32
      %c0_98 = arith.constant 0 : index
      %c0_99 = arith.constant 0 : index
      %c0_100 = arith.constant 0 : index
      %c0_101 = arith.constant 0 : index
      %193 = vector.load %arg2[%c0_98, %c0_99, %c0_100, %c0_101] : memref<3x2x64x64xf32, #tpu.memory_space<vmem>>, vector<1x1x64x64xf32>
      %194 = vector.shape_cast %193 : vector<1x1x64x64xf32> to vector<64x64xf32>
      %c0_102 = arith.constant 0 : index
      %c1_103 = arith.constant 1 : index
      %c0_104 = arith.constant 0 : index
      %c0_105 = arith.constant 0 : index
      %195 = vector.load %arg2[%c0_102, %c1_103, %c0_104, %c0_105] : memref<3x2x64x64xf32, #tpu.memory_space<vmem>>, vector<1x1x64x64xf32>
      %196 = vector.shape_cast %195 : vector<1x1x64x64xf32> to vector<64x64xf32>
      %c0_106 = arith.constant 0 : index
      %c0_107 = arith.constant 0 : index
      %c0_108 = arith.constant 0 : index
      %197 = vector.load %arg3[%c0_106, %c0_107, %c0_108] : memref<3x3x64xf32, #tpu.memory_space<vmem>>, vector<1x1x64xf32>
      %198 = vector.shape_cast %197 : vector<1x1x64xf32> to vector<1x64xf32>
      %c0_109 = arith.constant 0 : index
      %c1_110 = arith.constant 1 : index
      %c0_111 = arith.constant 0 : index
      %199 = vector.load %arg3[%c0_109, %c1_110, %c0_111] : memref<3x3x64xf32, #tpu.memory_space<vmem>>, vector<1x1x64xf32>
      %200 = vector.shape_cast %199 : vector<1x1x64xf32> to vector<1x64xf32>
      %c0_112 = arith.constant 0 : index
      %c2_113 = arith.constant 2 : index
      %c0_114 = arith.constant 0 : index
      %201 = vector.load %arg3[%c0_112, %c2_113, %c0_114] : memref<3x3x64xf32, #tpu.memory_space<vmem>>, vector<1x1x1xf32>
      %202 = vector.shape_cast %201 : vector<1x1x1xf32> to vector<1x1xf32>
      %cst_115 = arith.constant dense<0.000000e+00> : vector<8x64xf32>
      %203 = tpu.matmul %148, %194, %cst_115 {dimension_numbers = #tpu.dot_dimension_numbers<[1], [0], [0], [1], [0, 0, 1, 1], [], []>} : vector<8x64xf32>, vector<64x64xf32>, vector<8x64xf32> -> vector<8x64xf32>
      %cst_116 = arith.constant dense<0.000000e+00> : vector<8x64xf32>
      %204 = tpu.matmul %36, %196, %cst_116 {dimension_numbers = #tpu.dot_dimension_numbers<[1], [0], [0], [1], [0, 0, 1, 1], [], []>} : vector<8x64xf32>, vector<64x64xf32>, vector<8x64xf32> -> vector<8x64xf32>
      %205 = arith.addf %203, %204 : vector<8x64xf32>
      %206 = vector.broadcast %198 : vector<1x64xf32> to vector<8x64xf32>
      %207 = arith.addf %205, %206 : vector<8x64xf32>
      %208 = math.tanh %207 : vector<8x64xf32>
      %209 = vector.broadcast %200 : vector<1x64xf32> to vector<8x64xf32>
      %210 = arith.mulf %208, %209 : vector<8x64xf32>
      %cst_117 = arith.constant dense<0.000000e+00> : vector<8xf32>
      %211 = vector.multi_reduction <add>, %210, %cst_117 [1] : vector<8x64xf32> to vector<8xf32>
      %212 = vector.shape_cast %211 : vector<8xf32> to vector<8x1xf32>
      %213 = vector.broadcast %202 : vector<1x1xf32> to vector<8x1xf32>
      %214 = arith.addf %212, %213 : vector<8x1xf32>
      %215 = arith.negf %214 : vector<8x1xf32>
      %216 = math.exp %215 : vector<8x1xf32>
      %cst_118 = arith.constant 1.000000e+00 : f32
      %217 = vector.broadcast %cst_118 : f32 to vector<8x1xf32>
      %218 = arith.addf %217, %216 : vector<8x1xf32>
      %219 = arith.divf %217, %218 : vector<8x1xf32>
      %220 = vector.broadcast %219 : vector<8x1xf32> to vector<8x64xf32>
      %221 = arith.mulf %220, %148 : vector<8x64xf32>
      %cst_119 = arith.constant 1.000000e+00 : f32
      %222 = vector.broadcast %cst_119 : f32 to vector<8x1xf32>
      %223 = arith.subf %222, %219 : vector<8x1xf32>
      %224 = vector.broadcast %223 : vector<8x1xf32> to vector<8x64xf32>
      %225 = arith.mulf %224, %36 : vector<8x64xf32>
      %226 = arith.addf %221, %225 : vector<8x64xf32>
      %227 = arith.truncf %226 : vector<8x64xf32> to vector<8x64xbf16>
      %c0_120 = arith.constant 0 : index
      %c0_121 = arith.constant 0 : index
      %228 = vector.load %arg9[%c0_120, %c0_121] : memref<8x64xbf16, #tpu.memory_space<vmem>>, vector<8x64xbf16>
      tpu.vector_store %arg9[%c0_120, %c0_121], %227 {strides = array<i32>} : memref<8x64xbf16, #tpu.memory_space<vmem>>, vector<8x64xbf16>,
      %cst_122 = arith.constant 0xFF800000 : f32
      %229 = vector.broadcast %cst_122 : f32 to vector<8x1xf32>
      %c0_123 = arith.constant 0 : index
      %c0_124 = arith.constant 0 : index
      %230 = vector.load %arg10[%c0_123, %c0_124] : memref<8x1xf32, #tpu.memory_space<vmem>>, vector<8x1xf32>
      tpu.vector_store %arg10[%c0_123, %c0_124], %229 {strides = array<i32>} : memref<8x1xf32, #tpu.memory_space<vmem>>, vector<8x1xf32>,
      %cst_125 = arith.constant 0.000000e+00 : f32
      %231 = vector.broadcast %cst_125 : f32 to vector<8x1xf32>
      %c0_126 = arith.constant 0 : index
      %c0_127 = arith.constant 0 : index
      %232 = vector.load %arg11[%c0_126, %c0_127] : memref<8x1xf32, #tpu.memory_space<vmem>>, vector<8x1xf32>
      tpu.vector_store %arg11[%c0_126, %c0_127], %231 {strides = array<i32>} : memref<8x1xf32, #tpu.memory_space<vmem>>, vector<8x1xf32>,
      %c0_128 = arith.constant 0 : index
      %233 = memref.load %arg8[%c0_128] : memref<2xf32, #tpu.memory_space<smem>>
      memref.store %192, %arg8[%c0_128] : memref<2xf32, #tpu.memory_space<smem>>
      %c1_129 = arith.constant 1 : index
      %234 = memref.load %arg8[%c1_129] : memref<2xf32, #tpu.memory_space<smem>>
      memref.store %80, %arg8[%c1_129] : memref<2xf32, #tpu.memory_space<smem>>
    } else {
    }
    %c0 = arith.constant 0 : index
    %c0_1 = arith.constant 0 : index
    %3 = vector.load %arg9[%c0, %c0_1] : memref<8x64xbf16, #tpu.memory_space<vmem>>, vector<8x64xbf16>
    %c0_2 = arith.constant 0 : index
    %c0_3 = arith.constant 0 : index
    %4 = vector.load %arg4[%c0_2, %c0_3] : memref<64x256xbf16, #tpu.memory_space<vmem>>, vector<64x256xbf16>
    %cst = arith.constant dense<0.000000e+00> : vector<8x256xf32>
    %5 = tpu.matmul %3, %4, %cst {dimension_numbers = #tpu.dot_dimension_numbers<[1], [0], [0], [1], [0, 0, 1, 1], [], []>} : vector<8x64xbf16>, vector<64x256xbf16>, vector<8x256xf32> -> vector<8x256xf32>
    %c0_4 = arith.constant 0 : index
    %c0_5 = arith.constant 0 : index
    %6 = vector.load %arg5[%c0_4, %c0_5] : memref<1x256xf32, #tpu.memory_space<vmem>>, vector<1x256xf32>
    %7 = vector.broadcast %6 : vector<1x256xf32> to vector<8x256xf32>
    %8 = arith.addf %5, %7 : vector<8x256xf32>
    %c0_6 = arith.constant 0 : index
    %c0_7 = arith.constant 0 : index
    %9 = vector.load %arg6[%c0_6, %c0_7] : memref<8x256xf32, #tpu.memory_space<vmem>>, vector<8x256xf32>
    tpu.vector_store %arg6[%c0_6, %c0_7], %8 {strides = array<i32>} : memref<8x256xf32, #tpu.memory_space<vmem>>, vector<8x256xf32>,
    %c0_8 = arith.constant 0 : index
    %c0_9 = arith.constant 0 : index
    %10 = vector.load %arg10[%c0_8, %c0_9] : memref<8x1xf32, #tpu.memory_space<vmem>>, vector<8x1xf32>
    %cst_10 = arith.constant dense<0xFF800000> : vector<8xf32>
    %11 = vector.multi_reduction <maximumf>, %8, %cst_10 [1] : vector<8x256xf32> to vector<8xf32>
    %12 = vector.shape_cast %11 : vector<8xf32> to vector<8x1xf32>
    %13 = arith.maximumf %10, %12 : vector<8x1xf32>
    %14 = arith.subf %10, %13 : vector<8x1xf32>
    %15 = math.exp %14 : vector<8x1xf32>
    %c0_11 = arith.constant 0 : index
    %c0_12 = arith.constant 0 : index
    %16 = vector.load %arg11[%c0_11, %c0_12] : memref<8x1xf32, #tpu.memory_space<vmem>>, vector<8x1xf32>
    %17 = arith.mulf %15, %16 : vector<8x1xf32>
    %18 = vector.broadcast %13 : vector<8x1xf32> to vector<8x256xf32>
    %19 = arith.subf %8, %18 : vector<8x256xf32>
    %20 = math.exp %19 : vector<8x256xf32>
    %cst_13 = arith.constant dense<0.000000e+00> : vector<8xf32>
    %21 = vector.multi_reduction <add>, %20, %cst_13 [1] : vector<8x256xf32> to vector<8xf32>
    %22 = vector.shape_cast %21 : vector<8xf32> to vector<8x1xf32>
    %23 = arith.addf %17, %22 : vector<8x1xf32>
    %c0_14 = arith.constant 0 : index
    %c0_15 = arith.constant 0 : index
    %24 = vector.load %arg11[%c0_14, %c0_15] : memref<8x1xf32, #tpu.memory_space<vmem>>, vector<8x1xf32>
    tpu.vector_store %arg11[%c0_14, %c0_15], %23 {strides = array<i32>} : memref<8x1xf32, #tpu.memory_space<vmem>>, vector<8x1xf32>,
    %c0_16 = arith.constant 0 : index
    %c0_17 = arith.constant 0 : index
    %25 = vector.load %arg10[%c0_16, %c0_17] : memref<8x1xf32, #tpu.memory_space<vmem>>, vector<8x1xf32>
    tpu.vector_store %arg10[%c0_16, %c0_17], %13 {strides = array<i32>} : memref<8x1xf32, #tpu.memory_space<vmem>>, vector<8x1xf32>,
    %c3_i32 = arith.constant 3 : i32
    %26 = arith.cmpi eq, %arg0, %c3_i32 : i32
    %27 = arith.extui %26 : i1 to i32
    %c0_i32_18 = arith.constant 0 : i32
    %28 = arith.cmpi ne, %27, %c0_i32_18 : i32
    scf.if %28 {
      %c0_19 = arith.constant 0 : index
      %c0_20 = arith.constant 0 : index
      %29 = vector.load %arg10[%c0_19, %c0_20] : memref<8x1xf32, #tpu.memory_space<vmem>>, vector<8x1xf32>
      %c0_21 = arith.constant 0 : index
      %c0_22 = arith.constant 0 : index
      %30 = vector.load %arg11[%c0_21, %c0_22] : memref<8x1xf32, #tpu.memory_space<vmem>>, vector<8x1xf32>
      %31 = math.log %30 : vector<8x1xf32>
      %32 = arith.addf %29, %31 : vector<8x1xf32>
      %c0_23 = arith.constant 0 : index
      %c0_24 = arith.constant 0 : index
      %33 = vector.load %arg7[%c0_23, %c0_24] : memref<8x1xf32, #tpu.memory_space<vmem>>, vector<8x1xf32>
      tpu.vector_store %arg7[%c0_23, %c0_24], %32 {strides = array<i32>} : memref<8x1xf32, #tpu.memory_space<vmem>>, vector<8x1xf32>,
    } else {
    }
    return
  }
  func.func @transform_0(%arg0: i32) -> (i32, i32, i32) {
    %c0_i32 = arith.constant 0 : i32
    %c0_i32_0 = arith.constant 0 : i32
    %c0_i32_1 = arith.constant 0 : i32
    %c0_i32_2 = arith.constant 0 : i32
    return %c0_i32, %c0_i32_0, %c0_i32_1 : i32, i32, i32
  }
  func.func @transform_1(%arg0: i32) -> (i32, i32, i32, i32) {
    %c0_i32 = arith.constant 0 : i32
    %c0_i32_0 = arith.constant 0 : i32
    %c0_i32_1 = arith.constant 0 : i32
    %c0_i32_2 = arith.constant 0 : i32
    %c0_i32_3 = arith.constant 0 : i32
    return %c0_i32, %c0_i32_0, %c0_i32_1, %c0_i32_2 : i32, i32, i32, i32
  }
  func.func @transform_2(%arg0: i32) -> (i32, i32, i32) {
    %c0_i32 = arith.constant 0 : i32
    %c0_i32_0 = arith.constant 0 : i32
    %c0_i32_1 = arith.constant 0 : i32
    %c0_i32_2 = arith.constant 0 : i32
    return %c0_i32, %c0_i32_0, %c0_i32_1 : i32, i32, i32
  }
  func.func @transform_3(%arg0: i32) -> (i32, i32) {
    %c0_i32 = arith.constant 0 : i32
    %c0_i32_0 = arith.constant 0 : i32
    return %c0_i32, %arg0 : i32, i32
  }
  func.func @transform_4(%arg0: i32) -> (i32, i32) {
    %c0_i32 = arith.constant 0 : i32
    %c0_i32_0 = arith.constant 0 : i32
    return %c0_i32, %arg0 : i32, i32
  }
  func.func @transform_5(%arg0: i32) -> (i32, i32) {
    %c0_i32 = arith.constant 0 : i32
    %c0_i32_0 = arith.constant 0 : i32
    return %c0_i32, %arg0 : i32, i32
  }
  func.func @transform_6(%arg0: i32) -> (i32, i32) {
    %c0_i32 = arith.constant 0 : i32
    %c0_i32_0 = arith.constant 0 : i32
    %c0_i32_1 = arith.constant 0 : i32
    return %c0_i32, %c0_i32_0 : i32, i32
  }
  func.func @transform_7(%arg0: i32) -> i32 {
    %c0_i32 = arith.constant 0 : i32
    %c0_i32_0 = arith.constant 0 : i32
    return %c0_i32 : i32
  }
}

</mosaic_0001>

<bundles_post_ra>
// kernel: cross_model_forward.1
= control target key start
LH: loop header
LB: loop body
LE: loop exit
PB: predicated region body
PF: predicated region fallthrough
CT: control target
= control target key end

     0   :  { %s2500_s0 = inlined_call_operand.vmem [shape: f32[4,8,64], index: 0, kind: input, shape index: {}]   ;;  %s2501_s1 = inlined_call_operand.hbm [shape: f32[3,2,64,64], index: 1, kind: input, shape index: {}]   ;;  %s2502_s2 = inlined_call_operand.vmem [shape: f32[3,3,64], index: 2, kind: input, shape index: {}]   ;;  %s2503_s3 = inlined_call_operand.hbm [shape: bf16[64,1024], index: 3, kind: input, shape index: {}]   ;;  %s2504_s4 = inlined_call_operand.vmem [shape: f32[1,1024], index: 4, kind: input, shape index: {}]   ;;  %s2505_s5 = inlined_call_operand.vmem [shape: f32[8,1024], index: 5, kind: output, shape index: {0}]   ;;  %s2506_s6 = inlined_call_operand.vmem [shape: f32[8,1], index: 6, kind: output, shape index: {1}]   ;;  %s2507_s7 = inlined_call_operand.vmem [shape: f32[2], index: 7, kind: output, shape index: {2}]  }
   0x1   :  { %2511 = sst [smem:[#allocation14_spill]] %s2500_s0 }
   0x2   :  { %2512 = sst [smem:[#allocation15_spill]] %s2501_s1 }
   0x3   :  { %2513 = sst [smem:[#allocation16_spill]] %s2502_s2 }
   0x4   :  { %2514 = sst [smem:[#allocation17_spill]] %s2503_s3 }
   0x5   :  { %2515 = sst [smem:[#allocation18_spill]] %s2505_s5 }
   0x6   :  { %13 = vsyncpa [#allocation6], 0 }
   0x7   :  { %14 = vsyncpa [#allocation9], 0 }
   0x8   :  { %16 = vsyncpa [#allocation9 + $0x1], 0 }
   0x9   :  { %17 = vsyncpa [#allocation7], 0  ;;  %s2137_s24 = smov 0   ;;  %s2139_s25 = smov 0  }
   0xa   :  { %s2141_s26 = smov 0   ;;  %s2143_s27 = smov 0  }
   0xb LB: > { %s2156_s28 = sadd.s32 4294967295, %s2084_s27   ;;  %s2159_s29 = sadd.s32 1, %s2084_s27   ;;  %s2084_s27 = sphi %s2143_s27, %s2535_s27   ;;  %s2080_s26 = sphi %s2141_s26, %s2534_s26   ;;  %s2076_s25 = sphi %s2139_s25, %s2533_s25   ;;  %s2072_s24 = sphi %s2137_s24, %s2532_s24  }
   0xc   : > { %s90_s30 = ssub.s32 %s2084_s27, %s2159_s29  ;;  %s93_s8 = sadd.s32 1, %s2080_s26 }
   0xd   : > { %p91_p0 = scmp.eq.s32.totalorder %s90_s30, 0  ;;  %p100_p1 = scmp.ne.s32.totalorder %s2080_s26, %s2076_s25 }
   0xe   : > { %p101_p2 = scmp.eq.s32.totalorder %s2084_s27, 0  ;;  %p106_p3 = scmp.ne.s32.totalorder %s2076_s25, %s2072_s24 }
   0xf   : > { %s2169_s9 = scalar_select %p91_p0, %s2080_s26, %s93_s8  }
  0x10   : > { %p2171_p4 = por %p101_p2, %p100_p1  ;;  %p2508_p5 = scmp.eq.s32.totalorder %s2156_s28, 0 }
  0x11   : > { %p1599_p6 = scmp.ge.s32.totalorder %s2084_s27, 1  ;;  %p211_p7 = scmp.lt.s32.totalorder %s2084_s27, 5 }
  0x12   : > { %p2180_p8 = por %p2508_p5, %p106_p3  ;;  %s2086_s13 = smov [#allocation5]  }
  0x13   : > { %p2185_p10 = pnand %p1599_p6, %p211_p7  ;;  %s226_s14 = sshll.u32 %s2086_s13, 4  ;;  %s227_s14 = int_to_ptr.vmem [resolvable:$true] %s226_s14 }
  0x14   : > { %s2517_s11 = scalar_select %p2180_p8, 1, 0 }
  0x15   : > { %s2518_s12 = scalar_select %p2185_p10, 1, 0 }
  0x16   : > { %p1862_p11 = pneg %p2185_p10  ;;  %p1871_p13 = scmp.lt.s32.totalorder %s2084_s27, 4 }
  0x17   : > { %s243_s16 = sand.u32 1, %s2080_s26   ;;  %s1657_s17 = sshll.u32 %s2084_s27, 7 }
  0x18   : > { %p2193_p12 = pnand %p1862_p11, %p2508_p5  ;;  %p2202_p0 = pnand %p1871_p13, %p2171_p4 }
  0x19   : > { %s1985_s19 = scalar_lea.vmem %s227_s14, 6144  ;;  %p1993_p7 = scmp.lt.s32.totalorder %s227_s14, %s227_s14 }
  0x1a   : > { %p1976_p1 = pneg %p2193_p12  ;;  %p1986_p2 = scmp.ne.s32.totalorder %s227_s14, %s1985_s19 }
  0x1b   : > { %p1994_p11 = scmp.lt.s32.totalorder %s1985_s19, %s1985_s19 }
  0x1c   : > { %p1988_p3 = pnand %p1986_p2, %p1976_p1 }
  0x1d   : > { %p1995_p9 = por %p1994_p11, %p1993_p7 }
  0x1e   : > { %p1989_p6 = pneg %p1988_p3 }
  0x20   : > { %p1996_p5 = pnand %p1995_p9, %p1989_p6 }
  0x22   : > { %1999 = shalt.err (!%p1996_p5)
}
  0x23   : > { %s2087_s20 = smov 128   ;;  %s2088_s21 = smov 8  }
  0x24   : > { %s2521_s1 = sld [smem:[#allocation15_spill]]  ;;  %s1602_s24 = sshll.u32 %s243_s16, 6 }
  0x25   : > { %s2522_s3 = sld [smem:[#allocation17_spill]]  ;;  %s247_s10 = scalar_lea.vmem [#allocation8], %s1602_s24 }
  0x26   : > { %s254_s13 = sshll.u32 %s247_s10, 4  ;;  %s2223_s15 = scalar_lea.sflag [#allocation9], %s243_s16  ;;  %s2221_s13 = int_to_ptr.vmem [resolvable:$true] %s254_s13 }
  0x27   : > { %p2002_p5 = pneg %p2202_p0 }
  0x2a   : > { %1865 = dma.hbm_to_vmem [thread:$0]  (!%p2193_p12), %s2521_s1, 6144, %s227_s14, [#allocation6], %s2087_s20, %s2087_s20, %s2088_s21  }
  0x2b   : > { %s2219_s8 = scalar_lea.hbm %s2522_s3, %s1657_s17  ;;  %s2005_s17 = scalar_lea.hbm %s2522_s3, 4096 }
  0x2c   : > { %s2000_s19 = scalar_lea.hbm %s2219_s8, 1024  ;;  %p2006_p13 = scmp.lt.s32.totalorder %s2219_s8, %s2522_s3 }
  0x2d   : > { %p2001_p4 = scmp.ne.s32.totalorder %s2219_s8, %s2000_s19  ;;  %p2007_p1 = scmp.lt.s32.totalorder %s2005_s17, %s2000_s19 }
  0x2f   : > { %p2003_p9 = pnand %p2002_p5, %p2001_p4  ;;  %p2008_p2 = por %p2007_p1, %p2006_p13 }
  0x31   : > { %p2004_p12 = pneg %p2003_p9 }
  0x33   : > { %p2009_p3 = pnand %p2008_p2, %p2004_p12 }
  0x35   : > { %2012 = shalt.err (!%p2009_p3)
}
  0x36   : > { %s2013_s16 = scalar_lea.vmem %s2221_s13, 1024  ;;  %s2089_s24 = smov [#allocation8]  }
  0x37   : > { %p2014_p6 = scmp.ne.s32.totalorder %s2221_s13, %s2013_s16  ;;  %s2018_s30 = sshll.u32 %s2089_s24, 4  ;;  %s2019_s30 = int_to_ptr.vmem [resolvable:$false] %s2018_s30 }
  0x38   : > { %s2020_s10 = scalar_lea.vmem %s2019_s30, 2048  ;;  %p2021_p4 = scmp.lt.s32.totalorder %s2221_s13, %s2019_s30 }
  0x39   : > { %p2016_p7 = pnand %p2014_p6, %p2002_p5  ;;  %p2022_p9 = scmp.lt.s32.totalorder %s2020_s10, %s2013_s16 }
  0x3b   : > { %p2017_p11 = pneg %p2016_p7  ;;  %p2023_p8 = por %p2022_p9, %p2021_p4 }
  0x3d   : > { %p2024_p10 = pnand %p2023_p8, %p2017_p11 }
  0x3f   : > { %2027 = shalt.err (!%p2024_p10)
}
  0x40   : > { %s2090_s19 = smov 512   ;;  %p2523_p5 = scmp.ne.s32.totalorder %s2518_s12, 0 }
  0x41   : > { %1869 = dma.hbm_to_vmem [thread:$0]  (!%p2202_p0), %s2219_s8, 1024, %s2221_s13, %s2223_s15, %s2090_s19, %s2087_s20, %s2088_s21  }
  0x42   : > { %274 = sbr.rel (%p2523_p5) target bundleno = 2357 (0x935), region = 40  ;;  %p2524_p12 = scmp.eq.s32.totalorder (!%p2523_p5), %s2156_s28, 0 }
  0x47   : > { %2059 = dma.done.wait (%p2524_p12), [#allocation6], 6144   ;;  %p2525_p13 = pmov %p2524_p12 }
  0x48   : > { %s280_s14 = sand.u32 1, %s2076_s25   ;;  %p2526_p8 = scmp.ne.s32.totalorder %s2517_s11, 0 }
  0x49   : > { %2061 = vsyncadd (%p2525_p13), [#allocation6], 4294961152  ;;  %s1607_s22 = sshll.u32 %s280_s14, 6  ;;  %s281_s18 = scalar_lea.sflag [#allocation9], %s280_s14 }
  0x4a   : > { %s2253_s17 = scalar_lea.vmem [#allocation8], %s1607_s22 }
  0x4b   : > { %2063 = dma.done.wait (%p2526_p8), %s281_s18, 1024  }
  0x4c   : > { %2065 = vsyncadd (%p2526_p8), %s281_s18, 4294966272  ;;  %s1608_s12 = sshll.u32 %s2156_s28, 1  ;;  %s2527_s5 = sld [smem:[#allocation18_spill]] }
  0x4d   : > { %p321_p10 = scmp.lt.s32.totalorder %s1608_s12, 7  ;;  %p2528_p0 = scmp.ne.s32.totalorder %s2156_s28, 0 }
  0x4e   : > { %s2529_s0 = sld [smem:[#allocation14_spill]] (!%p2528_p0) }
  0x4f   : > { %s2537_s12 = smov (!%p321_p10, %s1608_s12), 7  ;;  %335 = sbr.rel (%p2528_p0) target bundleno = 1672 (0x688), region = 52 }
  0x50   : > { %s1610_s13 = sshll.u32 %s2537_s12, 3  ;;  %s2530_s2 = sld [smem:[#allocation16_spill]] (!%p2528_p0) }
  0x52   : > { %s2270_s27 = scalar_lea.vmem %s2527_s5, %s1610_s13 }
  0x54   : > { %v2277_v0 = vld [vmem:[%s2529_s0 + $0x8] sm:$0xff]  ;;  %vm343_vm0 = vcmask 523264   ;;  %v2091_v2 = vmov 0.0   ;;  %vm2092_vm1 = vmmov 0   ;;  %v2288_v3 = vld [vmem:[%s2529_s0] sm:$0xff]  ;;  %v545_v8 = vld [vmem:[#allocation5 + $0xe0] sm:$0xff] }
  0x55   : > { %v548_v1 = vld [vmem:[#allocation5 + $0xf8] sm:$0xff]  ;;  %1716 = vmatprep.subr.mxu0 %v2091_v2  ;;  %1721 = vmatprep.subr.mxu1 %v2091_v2  ;;  %v547_v4 = vld [vmem:[#allocation5 + $0xf0] sm:$0xff]  ;;  %v546_v6 = vld [vmem:[#allocation5 + $0xe8] sm:$0xff]  ;;  %v2093_v32 = vmov 0   ;;  %vm490_vm2 = vcmask 7168   ;;  %vm513_vm11 = vcmask 64512  }
  0x56   : > { %1717 = vmatpush3.xpose.msk.msra.mxu0 %vm343_vm0, %v2277_v0  ;;  %1718 = vmatprep.mubr.msk.f32.mxu0 %vm2092_vm1, %v2091_v2  ;;  %v539_v5 = vld [vmem:[#allocation5 + $0xb8] sm:$0xff]  ;;  %v538_v7 = vld [vmem:[#allocation5 + $0xb0] sm:$0xff]  ;;  %v537_v9 = vld [vmem:[#allocation5 + $0xa8] sm:$0xff]  ;;  %1327 = vst.msk [vmem:[#allocation4] sm:$0xff] %vm490_vm2, %v2091_v2  ;;  %vm1324_vm12 = vcmask 519168  }
  0x57   : > { %1722 = vmatpush3.msra.mxu1 %v548_v1  ;;  %1740 = vmatprep.subr.mxu0 %v2091_v2  ;;  %v544_v10 = vld [vmem:[#allocation5 + $0xd8] sm:$0xff]  ;;  %v536_v11 = vld [vmem:[#allocation5 + $0xa0] sm:$0xff]  ;;  %v543_v12 = vld [vmem:[#allocation5 + $0xd0] sm:$0xff] }
  0x58   : > { %1723 = vmatprep.subr.mxu1 %v2091_v2  ;;  %1737 = vmatprep.mubr.msk.f32.mxu1 %vm2092_vm1, %v2091_v2  ;;  %v535_v13 = vld [vmem:[#allocation5 + $0x98] sm:$0xff]  ;;  %v542_v14 = vld [vmem:[#allocation5 + $0xc8] sm:$0xff]  ;;  %v534_v15 = vld [vmem:[#allocation5 + $0x90] sm:$0xff] }
  0x59   : > { %1719 = vmatmul.mubr.msk.f32.vlgmr.msra.gmra.mxu0 %vm343_vm0, %v2288_v3  ;;  %1724 = vmatpush3.msra.mxu1 %v547_v4  ;;  %v541_v16 = vld [vmem:[#allocation5 + $0xc0] sm:$0xff]  ;;  %v533_v17 = vld [vmem:[#allocation5 + $0x88] sm:$0xff]  ;;  %v1622_v23 = vld [vmem:[%s2530_s2 + $0x4] ss:$0 sm:$0xff] }
  0x5a   : > { %1741 = vmatpush3.msra.mxu0 %v539_v5  ;;  %1725 = vmatprep.subr.mxu1 %v2091_v2  ;;  %v532_v18 = vld [vmem:[#allocation5 + $0x80] sm:$0xff]  ;;  %v1623_v28 = vld [vmem:[%s2530_s2 + $0x5] ss:$0 sm:$0xff]  ;;  %v740_v33 = vld [vmem:[#allocation5 + $0x138] sm:$0xff] }
  0x5b   : > { %1742 = vmatprep.subr.mxu0 %v2091_v2  ;;  %1726 = vmatpush3.msra.mxu1 %v546_v6  ;;  %v749_v34 = vld [vmem:[#allocation5 + $0x178] sm:$0xff]  ;;  %v739_v35 = vld [vmem:[#allocation5 + $0x130] sm:$0xff]  ;;  %v738_v37 = vld [vmem:[#allocation5 + $0x128] sm:$0xff] }
  0x5c   : > { %1743 = vmatpush3.msra.mxu0 %v538_v7  ;;  %1727 = vmatprep.subr.mxu1 %v2091_v2  ;;  %v748_v36 = vld [vmem:[#allocation5 + $0x170] sm:$0xff]  ;;  %v747_v38 = vld [vmem:[#allocation5 + $0x168] sm:$0xff]  ;;  %v737_v39 = vld [vmem:[#allocation5 + $0x120] sm:$0xff] }
  0x5d   : > { %1744 = vmatprep.subr.mxu0 %v2091_v2  ;;  %1728 = vmatpush3.msra.mxu1 %v545_v8  ;;  %v746_v40 = vld [vmem:[#allocation5 + $0x160] sm:$0xff]  ;;  %v736_v41 = vld [vmem:[#allocation5 + $0x118] sm:$0xff]  ;;  %v735_v43 = vld [vmem:[#allocation5 + $0x110] sm:$0xff] }
  0x5e   : > { %1745 = vmatpush3.msra.mxu0 %v537_v9  ;;  %1729 = vmatprep.subr.mxu1 %v2091_v2  ;;  %v745_v42 = vld [vmem:[#allocation5 + $0x158] sm:$0xff]  ;;  %v1624_v44 = vld [vmem:[%s2530_s2 + $0x6] ss:$0 sm:$0xff]  ;;  %v734_v51 = vld [vmem:[#allocation5 + $0x108] sm:$0xff] }
  0x5f   : > { %1746 = vmatprep.subr.mxu0 %v2091_v2  ;;  %1730 = vmatpush3.msra.mxu1 %v544_v10  ;;  %v744_v50 = vld [vmem:[#allocation5 + $0x150] sm:$0xff]  ;;  %v743_v52 = vld [vmem:[#allocation5 + $0x148] sm:$0xff]  ;;  %v733_v53 = vld [vmem:[#allocation5 + $0x100] sm:$0xff] }
  0x60   : > { %1747 = vmatpush3.msra.mxu0 %v536_v11  ;;  %1731 = vmatprep.subr.mxu1 %v2091_v2  ;;  %v2349_v55 = vld [vmem:[%s2529_s0 + $0x10] sm:$0xff]  ;;  %v1631_v4 = vld [vmem:[%s2530_s2 + $0x8] ss:$0 sm:$0xff]  ;;  %v1632_v9 = vld [vmem:[%s2530_s2 + $0x9] ss:$0 sm:$0xff] }
  0x61   : > { %1748 = vmatprep.subr.mxu0 %v2091_v2  ;;  %1732 = vmatpush3.msra.mxu1 %v543_v12  ;;  %v742_v57 = vld [vmem:[#allocation5 + $0x140] sm:$0xff] }
  0x62   : > { %1749 = vmatpush3.msra.mxu0 %v535_v13  ;;  %1733 = vmatprep.subr.mxu1 %v2091_v2  ;;  %v2376_v13 = vld [vmem:[%s2529_s0 + $0x18] sm:$0xff] }
  0x63   : > { %1750 = vmatprep.subr.mxu0 %v2091_v2  ;;  %1734 = vmatpush3.msra.mxu1 %v542_v14  ;;  %v1633_v14 = vld [vmem:[%s2530_s2 + $0xa] ss:$0 sm:$0xff] }
  0x64   : > { %1751 = vmatpush3.msra.mxu0 %v534_v15  ;;  %1735 = vmatprep.subr.mxu1 %v2091_v2 }
  0x65   : > { %1752 = vmatprep.subr.mxu0 %v2091_v2  ;;  %1736 = vmatpush3.msra.mxu1 %v541_v16 }
  0x66   : > { %1753 = vmatpush3.msra.mxu0 %v533_v17  ;;  %1738 = vmatmul.mubr.msk.f32.vlgmr.msra.gmra.mxu1 %vm343_vm0, %v2277_v0 }
  0x67   : > { %1754 = vmatprep.subr.mxu0 %v2091_v2  ;;  %1756 = vmatprep.mubr.msk.f32.mxu0 %vm2092_vm1, %v2091_v2 }
  0x68   : > { %1755 = vmatpush3.msra.mxu0 %v532_v18  ;;  %1759 = vmatprep.subr.mxu1 %v2091_v2 }
  0x69   : > { %1757 = vmatmul.mubr.msk.f32.vlgmr.msra.gmra.mxu0 %vm343_vm0, %v2288_v3  ;;  %1778 = vmatprep.subr.mxu0 %v2091_v2 }
  0x6a   : > { %1794 = vmatprep.mubr.msk.f32.mxu0 %vm2092_vm1, %v2091_v2  ;;  %1775 = vmatprep.mubr.msk.f32.mxu1 %vm2092_vm1, %v2091_v2 }
  0x6b   : > { %1917 = vset.pattern.permute.xlu0 %v2093_v32  ;;  %1918 = vset.pattern.permute.xlu1 %v2093_v32  ;;  %v1019_v32 = vmul.f32 %v2376_v13, %v2376_v13 }
  0x6c   : > { %1779 = vmatpush3.msra.mxu0 %v740_v33  ;;  %1760 = vmatpush3.msra.mxu1 %v749_v34  ;;  %v420_v34 = vmul.f32 %v2288_v3, %v2288_v3 }
  0x6d   : > { %1780 = vmatprep.subr.mxu0 %v2091_v2  ;;  %1761 = vmatprep.subr.mxu1 %v2091_v2 }
  0x6e   : > { %1781 = vmatpush3.msra.mxu0 %v739_v35  ;;  %1762 = vmatpush3.msra.mxu1 %v748_v36  ;;  %v1020_v35 = vsel %vm343_vm0, %v1019_v32, 0.0  ;;  %v475_v36 = vmul.f32 %v2277_v0, %v2288_v3 }
  0x6f   : > { %1782 = vmatprep.subr.mxu0 %v2091_v2  ;;  %1763 = vmatprep.subr.mxu1 %v2091_v2 }
  0x70   : > { %1783 = vmatpush3.msra.mxu0 %v738_v37  ;;  %1764 = vmatpush3.msra.mxu1 %v747_v38  ;;  %v421_v37 = vsel %vm343_vm0, %v420_v34, 0.0  ;;  %v476_v38 = vsel %vm343_vm0, %v475_v36, 0.0 }
  0x71   : > { %1784 = vmatprep.subr.mxu0 %v2091_v2  ;;  %1765 = vmatprep.subr.mxu1 %v2091_v2 }
  0x72   : > { %1785 = vmatpush3.msra.mxu0 %v737_v39  ;;  %1766 = vmatpush3.msra.mxu1 %v746_v40 }
  0x73   : > { %1786 = vmatprep.subr.mxu0 %v2091_v2  ;;  %1767 = vmatprep.subr.mxu1 %v2091_v2 }
  0x74   : > { %1787 = vmatpush3.msra.mxu0 %v736_v41  ;;  %1768 = vmatpush3.msra.mxu1 %v745_v42 }
  0x75   : > { %1788 = vmatprep.subr.mxu0 %v2091_v2  ;;  %1769 = vmatprep.subr.mxu1 %v2091_v2 }
  0x76   : > { %1789 = vmatpush3.msra.mxu0 %v735_v43  ;;  %1770 = vmatpush3.msra.mxu1 %v744_v50  ;;  %v1127_v50 = vld [vmem:[#allocation5 + $0x18] sm:$0xff] }
  0x77   : > { %1790 = vmatprep.subr.mxu0 %v2091_v2  ;;  %1771 = vmatprep.subr.mxu1 %v2091_v2 }
  0x78   : > { %1791 = vmatpush3.msra.mxu0 %v734_v51  ;;  %1772 = vmatpush3.msra.mxu1 %v743_v52  ;;  %v1126_v51 = vld [vmem:[#allocation5 + $0x10] sm:$0xff]  ;;  %v1125_v52 = vld [vmem:[#allocation5 + $0x8] sm:$0xff] }
  0x79   : > { %1792 = vmatprep.subr.mxu0 %v2091_v2  ;;  %1773 = vmatprep.subr.mxu1 %v2091_v2 }
  0x7a   : > { %1793 = vmatpush3.msra.mxu0 %v733_v53  ;;  %1774 = vmatpush3.msra.mxu1 %v742_v57  ;;  %v1124_v53 = vld [vmem:[#allocation5] sm:$0xff] }
  0x7b   : > { %1795 = vmatmul.mubr.msk.f32.vlgmr.msra.gmra.mxu0 %vm343_vm0, %v2349_v55  ;;  %1797 = vmatprep.subr.mxu1 %v2091_v2 }
  0x7c   : > { %1802 = vmatprep.subr.mxu0 %v2091_v2  ;;  %1818 = vmatprep.mubr.msk.f32.mxu0 %vm2092_vm1, %v2091_v2 }
 0x119   : > { %v2321_v19 = vpop.f32.mrf.mxu0 }
 0x11b   : > { %v1720_v20 = vpop.f32.mrf.mxu0 }
 0x126   : > { %v619_v21 = vpop.f32.mrf.mxu1 }
 0x128   : > { %v1739_v22 = vpop.f32.mrf.mxu1 }
 0x129   : > { %v689_v24 = vpop.f32.mrf.mxu0  ;;  %v1140_v22 = vld [vmem:[#allocation5 + $0x78] sm:$0xff] }
 0x12a   : > { %v690_v25 = vadd.f32 %v689_v24, %v619_v21  ;;  %1803 = vmatpush3.msra.mxu0 %v1140_v22  ;;  %v1139_v24 = vld [vmem:[#allocation5 + $0x70] sm:$0xff] }
 0x12b   : > { %v1758_v26 = vpop.f32.mrf.mxu0  ;;  %1804 = vmatprep.subr.mxu0 %v2091_v2 }
 0x12c   : > { %v697_v27 = vadd.f32 %v1622_v23, %v690_v25  ;;  %1805 = vmatpush3.msra.mxu0 %v1139_v24  ;;  %v1138_v25 = vld [vmem:[#allocation5 + $0x68] sm:$0xff]  ;;  %v1137_v26 = vld [vmem:[#allocation5 + $0x60] sm:$0xff] }
 0x12d   : > { %1806 = vmatprep.subr.mxu0 %v2091_v2 }
 0x12e   : > { %1919 = vtanh.f32 %v697_v27  ;;  %1807 = vmatpush3.msra.mxu0 %v1138_v25  ;;  %v1136_v27 = vld [vmem:[#allocation5 + $0x58] sm:$0xff] }
 0x12f   : > { %1808 = vmatprep.subr.mxu0 %v2091_v2 }
 0x130   : > { %1809 = vmatpush3.msra.mxu0 %v1137_v26 }
 0x131   : > { %1810 = vmatprep.subr.mxu0 %v2091_v2 }
 0x132   : > { %1811 = vmatpush3.msra.mxu0 %v1136_v27 }
 0x133   : > { %1812 = vmatprep.subr.mxu0 %v2091_v2 }
 0x13b   : > { %v1920_v29 = vpop.eup %1919  ;;  %v896_v63 = vpop.f32.mrf.mxu0 }
 0x13c   : > { %v703_v30 = vmul.f32 %v1920_v29, %v1623_v28  ;;  %v1135_v28 = vld [vmem:[#allocation5 + $0x50] sm:$0xff]  ;;  %v1134_v29 = vld [vmem:[#allocation5 + $0x48] sm:$0xff] }
 0x13d   : > { %v1796_v1 = vpop.f32.mrf.mxu0  ;;  %1813 = vmatpush3.msra.mxu0 %v1135_v28 }
 0x13e   : > { %v704_v31 = vsel %vm343_vm0, %v703_v30, 0.0  ;;  %1814 = vmatprep.subr.mxu0 %v2091_v2  ;;  %v1133_v30 = vld [vmem:[#allocation5 + $0x40] sm:$0xff] }
 0x13f   : > { %705 = vadd.xlane.f32.xlu0 %v704_v31  ;;  %1815 = vmatpush3.msra.mxu0 %v1134_v29  ;;  %v424_v31 = vmul.f32 %v2277_v0, %v2277_v0 }
 0x140   : > { %1816 = vmatprep.subr.mxu0 %v2091_v2 }
 0x141   : > { %1817 = vmatpush3.msra.mxu0 %v1133_v30  ;;  %v425_v33 = vsel %vm343_vm0, %v424_v31, 0.0 }
 0x142   : > { %1819 = vmatmul.mubr.msk.f32.vlgmr.msra.gmra.mxu0 %vm343_vm0, %v2376_v13 }
 0x1c8   : > { %v706_v45 = vpop.xlane.xlu0 %705 }
 0x1c9   : > { %v711_v46 = vadd.f32 %v1624_v44, %v706_v45  ;;  %v1131_v44 = vld [vmem:[#allocation5 + $0x38] sm:$0xff] }
 0x1cb   : > { %v1625_v47 = vmul.f32 -1.442695, %v711_v46 }
 0x1cd   : > { %1921 = vpow2.f32 %v1625_v47 }
 0x1da   : > { %v1922_v48 = vpop.eup %1921 }
 0x1db   : > { %v715_v49 = vadd.f32 1.0, %v1922_v48  ;;  %v1129_v48 = vld [vmem:[#allocation5 + $0x28] sm:$0xff] }
 0x1dd   : > { %1923 = vrcp.f32 %v715_v49  ;;  %v1128_v49 = vld [vmem:[#allocation5 + $0x20] sm:$0xff] }
 0x1ea   : > { %v1924_v54 = vpop.eup %1923 }
 0x1eb   : > { %720 = vperm.xlu0 %1917, %v1924_v54   ;;  %v724_v56 = vsub.f32 1.0, %v1924_v54  ;;  %v2094_v54 = vmov -inf  }
 0x1ec   : > { %1326 = vst.msk [vmem:[#allocation3] sm:$0xff] %vm490_vm2, %v2094_v54 }
 0x1ed   : > { %727 = vperm.xlu1 %1918, %v724_v56  }
 0x266   : > { %v721_v58 = vpop.permute.xlu0 %720 }
 0x267   : > { %v723_v60 = vmul.f32 %v721_v58, %v2288_v3 }
 0x268   : > { %v728_v59 = vpop.permute.xlu1 %727 }
 0x269   : > { %v730_v61 = vmul.f32 %v2277_v0, %v728_v59  ;;  %v1130_v0 = vld [vmem:[#allocation5 + $0x30] sm:$0xff] }
 0x26b   : > { %v2360_v62 = vadd.f32 %v730_v61, %v723_v60 }
 0x26d   : > { %1776 = vmatmul.mubr.msk.f32.vlgmr.msra.gmra.mxu1 %vm343_vm0, %v2360_v62 }
 0x26e   : > { %1799 = vmatprep.mubr.msk.f32.mxu1 %vm2092_vm1, %v2091_v2  ;;  %1798 = vmatpush3.xpose.msk.msra.mxu1 %vm343_vm0, %v2376_v13 }
 0x26f   : > { %1821 = vmatprep.subr.mxu1 %v2091_v2 }
 0x32d   : > { %v823_v5 = vpop.f32.mrf.mxu1 }
 0x32e   : > { %v897_v6 = vadd.f32 %v896_v63, %v823_v5 }
 0x32f   : > { %v1777_v7 = vpop.f32.mrf.mxu1 }
 0x330   : > { %v904_v8 = vadd.f32 %v1631_v4, %v897_v6  ;;  %v1210_v4 = vpop.f32.mrf.mxu0 }
 0x332   : > { %1925 = vtanh.f32 %v904_v8  ;;  %v1820_v5 = vpop.f32.mrf.mxu0 }
 0x33f   : > { %v1926_v10 = vpop.eup %1925 }
 0x340   : > { %v910_v11 = vmul.f32 %v1926_v10, %v1632_v9 }
 0x342   : > { %v911_v12 = vsel %vm343_vm0, %v910_v11, 0.0 }
 0x343   : > { %912 = vadd.xlane.f32.xlu1 %v911_v12 }
 0x3cc   : > { %v913_v15 = vpop.xlane.xlu1 %912 }
 0x3cd   : > { %v918_v16 = vadd.f32 %v1633_v14, %v913_v15 }
 0x3cf   : > { %v1634_v17 = vmul.f32 -1.442695, %v918_v16 }
 0x3d1   : > { %1927 = vpow2.f32 %v1634_v17  ;;  %v460_v17 = vlaneseq }
 0x3de   : > { %v1928_v18 = vpop.eup %1927 }
 0x3df   : > { %v922_v20 = vadd.f32 1.0, %v1928_v18 }
 0x3e1   : > { %1929 = vrcp.f32 %v922_v20  ;;  %v461_v20 = vshrl.u32 %v460_v17, 7 }
 0x3ee   : > { %v1930_v21 = vpop.eup %1929 }
 0x3ef   : > { %927 = vperm.xlu1 %1918, %v1930_v21   ;;  %v931_v23 = vsub.f32 1.0, %v1930_v21  ;;  %v462_v21 = vsub.s32 0, %v461_v20 }
 0x3f1   : > { %934 = vperm.xlu0 %1917, %v931_v23  }
 0x410   : > { %426 = vadd.xlane.f32.xlu0 %v425_v33 }
 0x413   : > { %1021 = vadd.xlane.f32.xlu1 %v1020_v35 }
 0x414   : > { %422 = vadd.xlane.f32.xlu0 %v421_v37 }
 0x417   : > { %477 = vadd.xlane.f32.xlu1 %v476_v38 }
 0x46a   : > { %v928_v39 = vpop.permute.xlu1 %927 }
 0x46b   : > { %v930_v41 = vmul.f32 %v2349_v55, %v928_v39 }
 0x46c   : > { %v935_v40 = vpop.permute.xlu0 %934 }
 0x46d   : > { %v937_v42 = vmul.f32 %v935_v40, %v2360_v62 }
 0x46f   : > { %v2407_v43 = vadd.f32 %v937_v42, %v930_v41  ;;  %v1639_v42 = vld [vmem:[%s2530_s2] ss:$0 sm:$0xff] }
 0x471   : > { %1800 = vmatmul.mubr.msk.f32.vlgmr.msra.gmra.mxu1 %vm343_vm0, %v2407_v43  ;;  %v1070_v3 = vmul.f32 %v2376_v13, %v2407_v43  ;;  %v1015_v45 = vmul.f32 %v2407_v43, %v2407_v43 }
 0x472   : > { %1822 = vmatpush3.msra.mxu1 %v1131_v44  ;;  %1837 = vmatprep.mubr.msk.f32.mxu1 %vm2092_vm1, %v2091_v2 }
 0x473   : > { %1823 = vmatprep.subr.mxu1 %v2091_v2  ;;  %v1071_v46 = vsel %vm343_vm0, %v1070_v3, 0.0  ;;  %v1016_v47 = vsel %vm343_vm0, %v1015_v45, 0.0 }
 0x474   : > { %1824 = vmatpush3.msra.mxu1 %v1130_v0  ;;  %1072 = vadd.xlane.f32.xlu1 %v1071_v46 }
 0x475   : > { %1017 = vadd.xlane.f32.xlu0 %v1016_v47  ;;  %1825 = vmatprep.subr.mxu1 %v2091_v2 }
 0x476   : > { %1826 = vmatpush3.msra.mxu1 %v1129_v48 }
 0x477   : > { %1827 = vmatprep.subr.mxu1 %v2091_v2 }
 0x478   : > { %1828 = vmatpush3.msra.mxu1 %v1128_v49 }
 0x479   : > { %1829 = vmatprep.subr.mxu1 %v2091_v2 }
 0x47a   : > { %1830 = vmatpush3.msra.mxu1 %v1127_v50 }
 0x47b   : > { %1831 = vmatprep.subr.mxu1 %v2091_v2 }
 0x47c   : > { %1832 = vmatpush3.msra.mxu1 %v1126_v51  ;;  %v1640_v51 = vld [vmem:[%s2530_s2 + $0x1] ss:$0 sm:$0xff] }
 0x47d   : > { %1833 = vmatprep.subr.mxu1 %v2091_v2 }
 0x47e   : > { %1834 = vmatpush3.msra.mxu1 %v1125_v52 }
 0x47f   : > { %1835 = vmatprep.subr.mxu1 %v2091_v2 }
 0x480   : > { %1836 = vmatpush3.msra.mxu1 %v1124_v53 }
 0x481   : > { %1838 = vmatmul.mubr.msk.f32.vlgmr.msra.gmra.mxu1 %vm343_vm0, %v2407_v43 }
 0x499   : > { %v427_v55 = vpop.xlane.xlu0 %426 }
 0x49c   : > { %v1022_v59 = vpop.xlane.xlu1 %1021 }
 0x49d   : > { %v423_v56 = vpop.xlane.xlu0 %422 }
 0x49e   : > { %v479_v57 = vmul.f32 %v427_v55, %v423_v56 }
 0x4a0   : > { %v480_v58 = vadd.f32 1e-12, %v479_v57  ;;  %v478_v2 = vpop.xlane.xlu1 %477 }
 0x4a2   : > { %428 = vxpose.xlu0.b32.start.end [1/1] (short) (narrow) %v427_v55, 8  ;;  %1931 = vrsqrt.f32 %v480_v58  ;;  %vm483_vm3 = vcmp.eq.f32.partialorder %v480_v58, inf  ;;  %v486_v62 = vand.u32 2147483648, %v480_v58  ;;  %vm485_vm4 = vcmp.eq.f32.partialorder %v480_v58, 0.0 }
 0x4a7   : > { %1023 = vxpose.xlu1.b32.start.end [1/1] (short) (narrow) %v1022_v59, 8 }
 0x4af   : > { %v1932_v60 = vpop.eup %1931 }
 0x4b0   : > { %v482_v61 = vmul.f32 %v1932_v60, %v480_v58 }
 0x4b2   : > { %v484_v63 = vsel %vm483_vm3, %v480_v58, %v482_v61 }
 0x4b3   : > { %v487_v1 = vsel %vm485_vm4, %v486_v62, %v484_v63 }
 0x4b4   : > { %1933 = vrcp.f32 %v487_v1 }
 0x4c1   : > { %v1934_v6 = vpop.eup %1933 }
 0x4c2   : > { %v2431_v7 = vmul.f32 %v1934_v6, %v478_v2 }
 0x4c4   : > { %v491_v8 = vsel %vm490_vm2, %v2431_v7, 0.0 }
 0x4ce   : > { %492 = vadd.xlane.f32.xlu1 %v491_v8 }
 0x4fd   : > { %v1073_v24 = vpop.xlane.xlu1 %1072 }
 0x4fe   : > { %v1018_v9 = vpop.xlane.xlu0 %1017 }
 0x4ff   : > { %v1074_v10 = vmul.f32 %v1022_v59, %v1018_v9 }
 0x501   : > { %v1075_v11 = vadd.f32 1e-12, %v1074_v10  ;;  %v1641_v10 = vld [vmem:[%s2530_s2 + $0x2] ss:$0 sm:$0xff] }
 0x503   : > { %1935 = vrsqrt.f32 %v1075_v11  ;;  %vm1078_vm5 = vcmp.eq.f32.partialorder %v1075_v11, inf  ;;  %v1081_v15 = vand.u32 2147483648, %v1075_v11  ;;  %vm1080_vm6 = vcmp.eq.f32.partialorder %v1075_v11, 0.0 }
 0x510   : > { %v1936_v12 = vpop.eup %1935 }
 0x511   : > { %v1077_v14 = vmul.f32 %v1936_v12, %v1075_v11 }
 0x513   : > { %v1079_v16 = vsel %vm1078_vm5, %v1075_v11, %v1077_v14 }
 0x514   : > { %v1082_v18 = vsel %vm1080_vm6, %v1081_v15, %v1079_v16 }
 0x515   : > { %1937 = vrcp.f32 %v1082_v18 }
 0x51e   : > { %v444_v22 = vpop.trf.xlu0 }
 0x51f   : > { %v463_v23 = vrot.slane %v444_v22, %v462_v21 }
 0x521   : > { %v464_v26 = vmul.f32 %v463_v23, %v423_v56  ;;  %v501_v56 = vmul.f32 %v2431_v7, %v2431_v7 }
 0x522   : > { %v1938_v25 = vpop.eup %1937 }
 0x523   : > { %v1084_v27 = vmul.f32 %v1938_v25, %v1073_v24  ;;  %v1039_v28 = vpop.trf.xlu1  ;;  %v465_v30 = vadd.f32 1e-12, %v464_v26  ;;  %v502_v60 = vsel %vm490_vm2, %v501_v56, 0.0 }
 0x524   : > { %v1058_v32 = vrot.slane %v1039_v28, %v462_v21 }
 0x525   : > { %v1095_v29 = vmul.f32 %v1084_v27, %v1084_v27  ;;  %1939 = vrsqrt.f32 %v465_v30  ;;  %vm468_vm7 = vcmp.eq.f32.partialorder %v465_v30, inf  ;;  %v471_v39 = vand.u32 2147483648, %v465_v30 }
 0x526   : > { %v1059_v33 = vmul.f32 %v1058_v32, %v1018_v9  ;;  %vm470_vm8 = vcmp.eq.f32.partialorder %v465_v30, 0.0  ;;  %v1085_v7 = vsel %vm490_vm2, %v1084_v27, 0.0 }
 0x527   : > { %v1096_v31 = vsel %vm490_vm2, %v1095_v29, 0.0 }
 0x528   : > { %1097 = vadd.xlane.f32.xlu1 %v1096_v31  ;;  %v1060_v34 = vadd.f32 1e-12, %v1059_v33 }
 0x52a   : > { %1941 = vrsqrt.f32 %v1060_v34  ;;  %vm1063_vm9 = vcmp.eq.f32.partialorder %v1060_v34, inf  ;;  %v1066_v49 = vand.u32 2147483648, %v1060_v34  ;;  %vm1065_vm10 = vcmp.eq.f32.partialorder %v1060_v34, 0.0 }
 0x531   : > { %v1011_v35 = vpop.f32.mrf.mxu1 }
 0x532   : > { %v1940_v37 = vpop.eup %1939 }
 0x533   : > { %v1801_v36 = vpop.f32.mrf.mxu1  ;;  %v467_v38 = vmul.f32 %v1940_v37, %v465_v30 }
 0x535   : > { %v469_v40 = vsel %vm468_vm7, %v465_v30, %v467_v38 }
 0x536   : > { %v472_v3 = vsel %vm470_vm8, %v471_v39, %v469_v40 }
 0x537   : > { %v1942_v41 = vpop.eup %1941  ;;  %1943 = vrcp.f32 %v472_v3 }
 0x538   : > { %v1062_v46 = vmul.f32 %v1942_v41, %v1060_v34 }
 0x53a   : > { %v1064_v48 = vsel %vm1063_vm9, %v1060_v34, %v1062_v46 }
 0x53b   : > { %v1067_v50 = vsel %vm1065_vm10, %v1066_v49, %v1064_v48 }
 0x541   : > { %v1280_v44 = vpop.f32.mrf.mxu1 }
 0x542   : > { %v1281_v0 = vadd.f32 %v1280_v44, %v1210_v4 }
 0x543   : > { %v1839_v45 = vpop.f32.mrf.mxu1 }
 0x544   : > { %v1288_v47 = vadd.f32 %v1639_v42, %v1281_v0  ;;  %v1944_v52 = vpop.eup %1943 }
 0x545   : > { %v474_v57 = vmul.f32 %v1944_v52, %v2321_v19 }
 0x546   : > { %1945 = vtanh.f32 %v1288_v47 }
 0x547   : > { %1947 = vrcp.f32 %v1067_v50  ;;  %v512_v61 = vmul.f32 %v474_v57, %v474_v57 }
 0x549   : > { %v514_v5 = vsel %vm513_vm11, %v512_v61, 0.0 }
 0x553   : > { %v1946_v53 = vpop.eup %1945 }
 0x554   : > { %v1294_v54 = vmul.f32 %v1946_v53, %v1640_v51  ;;  %v1948_v63 = vpop.eup %1947 }
 0x555   : > { %v1069_v4 = vmul.f32 %v1948_v63, %v1011_v35 }
 0x556   : > { %v1295_v55 = vsel %vm343_vm0, %v1294_v54, 0.0 }
 0x557   : > { %1296 = vadd.xlane.f32.xlu0 %v1295_v55  ;;  %v493_v58 = vpop.xlane.xlu1 %492  ;;  %v1106_v8 = vmul.f32 %v1069_v4, %v1069_v4 }
 0x558   : > { %v494_v59 = vrot.slane %v493_v58, 4 }
 0x559   : > { %v1107_v9 = vsel %vm513_vm11, %v1106_v8, 0.0 }
 0x55a   : > { %v495_v62 = vadd.f32 %v494_v59, %v493_v58 }
 0x55b   : > { %503 = vadd.xlane.f32.xlu0 %v502_v60 }
 0x55c   : > { %v496_v1 = vrot.slane %v495_v62, 2 }
 0x55e   : > { %v497_v6 = vadd.f32 %v496_v1, %v495_v62 }
 0x55f   : > { %515 = vadd.xlane.f32.xlu0 %v514_v5 }
 0x560   : > { %v498_v2 = vrot.slane %v497_v6, 1 }
 0x562   : > { %v499_v19 = vadd.f32 %v498_v2, %v497_v6 }
 0x563   : > { %1086 = vadd.xlane.f32.xlu0 %v1085_v7 }
 0x564   : > { %1840 = vpush %v499_v19 }
 0x567   : > { %1108 = vadd.xlane.f32.xlu0 %v1107_v9 }
 0x595   : > { %s1841_s15 = spop %1840 }
 0x596   : > { %s524_s23 = smul.f32 2.0, %s1841_s15 }
 0x598   : > { %s525_s11 = ssub.f32 8.0, %s524_s23 }
 0x5b1   : > { %v1098_v12 = vpop.xlane.xlu1 %1097 }
 0x5b2   : > { %v1099_v16 = vrot.slane %v1098_v12, 4 }
 0x5b4   : > { %v1100_v21 = vadd.f32 %v1099_v16, %v1098_v12 }
 0x5b6   : > { %v1101_v27 = vrot.slane %v1100_v21, 2 }
 0x5b8   : > { %v1102_v36 = vadd.f32 %v1101_v27, %v1100_v21 }
 0x5ba   : > { %v1103_v3 = vrot.slane %v1102_v36, 1 }
 0x5bc   : > { %v1104_v49 = vadd.f32 %v1103_v3, %v1102_v36 }
 0x5e0   : > { %v1297_v11 = vpop.xlane.xlu0 %1296 }
 0x5e1   : > { %v1302_v14 = vadd.f32 %v1641_v10, %v1297_v11 }
 0x5e3   : > { %v1642_v15 = vmul.f32 -1.442695, %v1302_v14 }
 0x5e4   : > { %v504_v17 = vpop.xlane.xlu0 %503 }
 0x5e5   : > { %1949 = vpow2.f32 %v1642_v15  ;;  %v505_v18 = vrot.slane %v504_v17, 4 }
 0x5e7   : > { %v506_v20 = vadd.f32 %v505_v18, %v504_v17 }
 0x5e8   : > { %v516_v22 = vpop.xlane.xlu0 %515 }
 0x5e9   : > { %v507_v23 = vrot.slane %v506_v20, 2  ;;  %v517_v24 = vrot.slane %v516_v22, 4 }
 0x5eb   : > { %v518_v25 = vadd.f32 %v517_v24, %v516_v22  ;;  %v508_v26 = vadd.f32 %v507_v23, %v506_v20 }
 0x5ec   : > { %v1087_v28 = vpop.xlane.xlu0 %1086 }
 0x5ed   : > { %v519_v29 = vrot.slane %v518_v25, 2  ;;  %v1088_v30 = vrot.slane %v1087_v28, 4  ;;  %v509_v31 = vrot.slane %v508_v26, 1 }
 0x5ef   : > { %v1089_v32 = vadd.f32 %v1088_v30, %v1087_v28  ;;  %v510_v33 = vadd.f32 %v509_v31, %v508_v26  ;;  %v520_v34 = vadd.f32 %v519_v29, %v518_v25 }
 0x5f0   : > { %v1109_v35 = vpop.xlane.xlu0 %1108 }
 0x5f1   : > { %v1090_v37 = vrot.slane %v1089_v32, 2  ;;  %v1110_v38 = vrot.slane %v1109_v35, 4  ;;  %1842 = vpush %v510_v33  ;;  %v521_v39 = vrot.slane %v520_v34, 1 }
 0x5f2   : > { %v1950_v40 = vpop.eup %1949 }
 0x5f3   : > { %v1306_v41 = vadd.f32 1.0, %v1950_v40  ;;  %v1111_v42 = vadd.f32 %v1110_v38, %v1109_v35  ;;  %v522_v44 = vadd.f32 %v521_v39, %v520_v34  ;;  %v1091_v0 = vadd.f32 %v1090_v37, %v1089_v32 }
 0x5f5   : > { %1951 = vrcp.f32 %v1306_v41  ;;  %v1112_v45 = vrot.slane %v1111_v42, 2  ;;  %1844 = vpush %v522_v44  ;;  %v1092_v46 = vrot.slane %v1091_v0, 1 }
 0x5f7   : > { %v1093_v47 = vadd.f32 %v1092_v46, %v1091_v0  ;;  %v1113_v48 = vadd.f32 %v1112_v45, %v1111_v42 }
 0x5f9   : > { %1846 = vpush %v1093_v47  ;;  %v1114_v50 = vrot.slane %v1113_v48, 1 }
 0x5fa   : > { %1848 = vpush %v1104_v49 }
 0x5fb   : > { %v1115_v51 = vadd.f32 %v1114_v50, %v1113_v48 }
 0x5fd   : > { %1850 = vpush %v1115_v51 }
 0x602   : > { %v1952_v52 = vpop.eup %1951 }
 0x603   : > { %1311 = vperm.xlu1 %1918, %v1952_v52   ;;  %v1315_v53 = vsub.f32 1.0, %v1952_v52 }
 0x605   : > { %1318 = vperm.xlu0 %1917, %v1315_v53  }
 0x622   : > { %s1843_s16 = spop %1842 }
 0x623   : > { %s526_s24 = sadd.f32 %s1843_s16, %s525_s11 }
 0x625   : > { %s528_s19 = smul.f32 0.13, %s526_s24 }
 0x626   : > { %s1845_s30 = spop %1844 }
 0x627   : > { %s527_s10 = ssub.f32 %s1845_s30, %s1843_s16 }
 0x629   : > { %s529_s14 = smul.f32 0.87, %s527_s10 }
 0x62a   : > { %s1847_s22 = spop %1846 }
 0x62b   : > { %s530_s18 = sadd.f32 %s529_s14, %s528_s19  ;;  %s1117_s20 = smul.f32 2.0, %s1847_s22 }
 0x62c   : > { %s1849_s21 = spop %1848 }
 0x62d   : > { %1331 = sst [smem:[#allocation10 + $0x1]] %s530_s18 }
 0x62e   : > { %s1118_s13 = ssub.f32 8.0, %s1117_s20  ;;  %s1851_s8 = spop %1850 }
 0x62f   : > { %s1120_s0 = ssub.f32 %s1851_s8, %s1849_s21 }
 0x630   : > { %s1119_s1 = sadd.f32 %s1849_s21, %s1118_s13 }
 0x631   : > { %s1122_s2 = smul.f32 0.01, %s1120_s0 }
 0x632   : > { %s1121_s3 = smul.f32 0.99, %s1119_s1 }
 0x634   : > { %s1123_s5 = sadd.f32 %s1122_s2, %s1121_s3 }
 0x636   : > { %1329 = sst [smem:[#allocation10]] %s1123_s5 }
 0x67e   : > { %v1312_v54 = vpop.permute.xlu1 %1311 }
 0x67f   : > { %v1314_v56 = vmul.f32 %v1312_v54, %v2407_v43 }
 0x680   : > { %v1319_v55 = vpop.permute.xlu0 %1318 }
 0x681   : > { %v1321_v57 = vmul.f32 %v2376_v13, %v1319_v55 }
 0x683   : > { %v1322_v58 = vadd.f32 %v1321_v57, %v1314_v56 }
 0x685   : > { %v1323_v59 = vpack.c.bf16 %v1322_v58, %v1322_v58 }
 0x687   : > { %1325 = vst.msk [vmem:[#allocation2] sm:$0xf] %vm1324_vm12, %v1323_v59 }
 0x688 PF: > { %v1954_v60 = vld [vmem:[%s2253_s17 + $0x34] ss:$8 sps:$4 sm:$0xff]   ;;  %v1956_v61 = vld [vmem:[%s2253_s17 + $0x30] ss:$8 sps:$4 sm:$0xff]   ;;  %v2095_v62 = vmov 0   ;;  %vm1393_vm13 = vcmask 523264   ;;  %v1343_v2 = vlaneseq  ;;  %s2531_s2 = scalar_lea.vmem %s2504_s4, %s2537_s12 }
 0x689   : > { %1429 = vmatprep.mubr.bf16.mxu0 %v2095_v62  ;;  %1953 = vset.pattern.permute.xlu0 %v2095_v62  ;;  %v1957_v13 = vld [vmem:[%s2253_s17 + $0x24] ss:$8 sps:$4 sm:$0xff]   ;;  %v1959_v43 = vld [vmem:[%s2253_s17 + $0x20] ss:$8 sps:$4 sm:$0xff]   ;;  %v1960_v63 = vld [vmem:[%s2253_s17 + $0x14] ss:$8 sps:$4 sm:$0xff]  }
 0x68a   : > { %1405 = vmatprep.subr.bf16.mxu0 %v1954_v60  ;;  %v1962_v1 = vld [vmem:[%s2253_s17 + $0x10] ss:$8 sps:$4 sm:$0xff]   ;;  %v1963_v4 = vld [vmem:[%s2253_s17 + $0x4] ss:$8 sps:$4 sm:$0xff]   ;;  %v1965_v5 = vld [vmem:[%s2253_s17] ss:$8 sps:$4 sm:$0xff]  }
 0x68b   : > { %1406 = vmatpush1.bf16.msra.mxu0 %v1956_v61  ;;  %v1344_v8 = vshrl.u32 %v1343_v2, 7  ;;  %v1341_v19 = vld [vmem:[%s2531_s2] sm:$0x3]  ;;  %v1440_v21 = vld [vmem:[#allocation3] sm:$0xff]  ;;  %vm1465_vm14 = vcmask 7168   ;;  %v1448_v35 = vld [vmem:[#allocation4] sm:$0xff] }
 0x68c   : > { %1407 = vmatprep.subr.bf16.mxu0 %v1957_v13  ;;  %p1652_p1 = scmp.ne.s32.totalorder %s2156_s28, 3 }
 0x68d   : > { %v1345_v7 = vsub.s32 0, %v1344_v8  ;;  %v1349_v9 = vsub.s32 1, %v1344_v8 }
 0x68e   : > { %v1332_v6 = vld [vmem:[#allocation2] sm:$0xf] }
 0x68f   : > { %1408 = vmatpush1.bf16.msra.mxu0 %v1959_v43  ;;  %v1346_v10 = vrot.slane %v1341_v19, %v1345_v7  ;;  %v1350_v11 = vrot.slane %v1341_v19, %v1349_v9 }
 0x690   : > { %1409 = vmatprep.subr.bf16.mxu0 %v1960_v63 }
 0x693   : > { %1410 = vmatpush1.bf16.msra.mxu0 %v1962_v1 }
 0x694   : > { %1411 = vmatprep.subr.bf16.mxu0 %v1963_v4 }
 0x697   : > { %1412 = vmatpush1.bf16.msra.mxu0 %v1965_v5 }
 0x69a   : > { %1651 = vmatmul.mubr.msk.bf16.vlgmr.msra.gmra.mxu0 %vm1393_vm13, %v1332_v6 }
 0x75a   : > { %v1431_v12 = vpop.f32.mrf.mxu0 }
 0x75b   : > { %v1432_v14 = vadd.f32 %v1431_v12, %v1346_v10 }
 0x75c   : > { %v1433_v15 = vpop.f32.mrf.mxu0 }
 0x75d   : > { %1438 = vst [vmem:[%s2270_s27] sm:$0xff] %v1432_v14  ;;  %v1434_v16 = vadd.f32 %v1433_v15, %v1350_v11 }
 0x75e   : > { %v1435_v17 = vpop.f32.mrf.mxu0 }
 0x75f   : > { %1439 = vst [vmem:[%s2270_s27 + $0x8] sm:$0xff] %v1434_v16  ;;  %v1441_v18 = vmax.f32 %v1432_v14, %v1434_v16 }
 0x760   : > { %v1436_v20 = vpop.f32.mrf.mxu0 }
 0x761   : > { %1442 = vmax.xlane.f32.xlu0 %v1441_v18 }
 0x7ea   : > { %v1443_v22 = vpop.xlane.xlu0 %1442 }
 0x7eb   : > { %v1444_v23 = vmax.f32 %v1440_v21, %v1443_v22 }
 0x7ed   : > { %v1445_v24 = vsub.f32 %v1440_v21, %v1444_v23  ;;  %1467 = vst.msk [vmem:[#allocation3] sm:$0xff] %vm1465_vm14, %v1444_v23  ;;  %1452 = vperm.xlu0 %1953, %v1444_v23  }
 0x7ef   : > { %v1446_v33 = vmul.f32 1.442695, %v1445_v24 }
 0x868   : > { %v1453_v25 = vpop.permute.xlu0 %1452 }
 0x869   : > { %v1455_v26 = vsub.f32 %v1432_v14, %v1453_v25  ;;  %v1456_v27 = vsub.f32 %v1434_v16, %v1453_v25 }
 0x86b   : > { %v1457_v28 = vmul.f32 1.442695, %v1455_v26  ;;  %v1459_v29 = vmul.f32 1.442695, %v1456_v27 }
 0x86d   : > { %1966 = vpow2.f32 %v1457_v28 }
 0x86e   : > { %1968 = vpow2.f32 %v1459_v29 }
 0x86f   : > { %1970 = vpow2.f32 %v1446_v33 }
 0x87a   : > { %v1967_v30 = vpop.eup %1966 }
 0x87b   : > { %v1969_v31 = vpop.eup %1968 }
 0x87c   : > { %v1461_v32 = vadd.f32 %v1969_v31, %v1967_v30  ;;  %v1971_v34 = vpop.eup %1970 }
 0x87d   : > { %v1449_v36 = vmul.f32 %v1971_v34, %v1448_v35 }
 0x87e   : > { %1462 = vadd.xlane.f32.xlu1 %v1461_v32 }
 0x906   : > { %1471 = sbr.rel (%p1652_p1) target bundleno = 2341 (0x925), region = 56 }
 0x907   : > { %v1463_v37 = vpop.xlane.xlu1 %1462 }
 0x908   : > { %v1464_v38 = vadd.f32 %v1463_v37, %v1449_v36 }
 0x90a   : > { %1466 = vst.msk [vmem:[#allocation4] sm:$0xff] %vm1465_vm14, %v1464_v38 }
 0x90b   : > { %v1472_v41 = vld [vmem:[#allocation3] sm:$0xff] }
 0x911   : > { %v1473_v39 = vld [vmem:[#allocation4] sm:$0xff] }
 0x912   : > { %1972 = vlog2.f32 %v1473_v39 }
 0x91f   : > { %v1973_v40 = vpop.eup %1972 }
 0x920   : > { %v1475_v42 = vmul.f32 0.6931472, %v1973_v40 }
 0x922   : > { %v1476_v44 = vadd.f32 %v1475_v42, %v1472_v41 }
 0x924   : > { %1477 = vst.msk [vmem:[%s2506_s6] sm:$0xff] %vm1465_vm14, %v1476_v44 }
 0x925 PF: > { %p1873_p2 = scmp.eq.s32.totalorder %s2156_s28, 3  ;;  %s1497_s8 = sshll.u32 %s2507_s7, 4  ;;  %s1498_s8 = int_to_ptr.vmem [resolvable:$true] %s1497_s8 }
 0x926   : > { %s2028_s27 = scalar_lea.vmem %s1498_s8, 16  ;;  %p2035_p11 = scmp.lt.s32.totalorder %s1498_s8, %s1498_s8 }
 0x927   : > { %p2029_p3 = scmp.ne.s32.totalorder %s1498_s8, %s2028_s27  ;;  %p2036_p4 = scmp.lt.s32.totalorder %s2028_s27, %s2028_s27 }
 0x929   : > { %p2030_p6 = pnand %p2029_p3, %p1873_p2  ;;  %p2037_p9 = por %p2036_p4, %p2035_p11 }
 0x92b   : > { %p2031_p7 = pneg %p2030_p6 }
 0x92d   : > { %p2038_p5 = pnand %p2037_p9, %p2031_p7 }
 0x92f   : > { %2041 = shalt.err (!%p2038_p5)
}
 0x930   : > { %s2096_s15 = smov [#allocation10]  }
 0x931   : > { %1859 = dma.smem_to_vmem (%p1873_p2), %s2096_s15, 16, %s1498_s8, [#allocation7]  }
 0x932   : > { %2067 = dma.done.wait (%p1873_p2), [#allocation7], 16  }
 0x933   : > { %2069 = vsyncadd (%p1873_p2), [#allocation7], 4294967280 }
 0x934   : > { %1508 = sfence }
 0x935 PF: > { %p20_p12 = scmp.ge.s32.totalorder %s2159_s29, 6   ;;  %s2532_s24 = smov %s2076_s25 }
 0x936   : > { %s2533_s25 = smov %s2080_s26  ;;  %s2534_s26 = smov %s2169_s9 }
 0x937   : > { %s2535_s27 = smov %s2159_s29  ;;  %22 = sbr.rel (!%p20_p12) target bundleno = 11 (0xb), region = 125 }
 0x93c   :  { %1522 = vsyncpa [#allocation6], 1 }
 0x93d   :  { %1524 = vsyncpa [#allocation6 + $0x1], 1 }
 0x93e   :  { %1525 = vsyncpa [#allocation9], 1 }
 0x93f   :  { %1527 = vsyncpa [#allocation9 + $0x1], 1 }
 0x940   :  { %1528 = vsyncpa [#allocation7], 1 }
 0x941   :  { %1530 = vsyncpa [#allocation7 + $0x1], 1 }

</bundles_post_ra>
